<compile_context>
chip_gen: v6e
topology: v6e:2x2x1
jax: 0.10.0
libtpu: 0.0.40
codegen_flags: <defaults>
</compile_context>

<pallas_src>
import jax
import jax.numpy as jnp
from jax.experimental import pallas as pl
from jax.experimental.pallas import tpu as pltpu

EPS = 1e-5  # torch.nn.BatchNorm1d default eps


def _vmem():
    # whole-array block resident in VMEM (shapes here are tiny)
    return pl.BlockSpec(memory_space=pltpu.MemorySpace.VMEM)


def _ceil_to(x, m):
    return (x + m - 1) // m * m


def make_fused_kernel(N, E, H, Fe, L, offs):
    """Builds the fused kernel closure over static sizes / slab row offsets."""
    H2 = 2 * H
    f32, bf16 = jnp.float32, jnp.bfloat16
    o_we, we_stride, o_w1, o_w2, o_vec, vec_stride, o_wp, o_bp = offs

    def kernel(h_ref, ea_ref, g_ref, s_ref, pm_ref, slab_ref, out_ref):
        h = h_ref[...]          # (N, H)  f32 node features (layer-0 embeddings)
        ea = ea_ref[...]        # (E, Fe) bf16 edge attributes (0/1 -> exact)
        g = g_ref[...]          # (E, N)  bf16 one-hot gather   (edge_index[1])
        s = s_ref[...]          # (N, E)  bf16 one-hot scatter  (edge_index[0])

        ones_n = jnp.ones((1, N), f32)   # hoisted BN-stats reducer row (MXU)
        inv_n = 1.0 / N

        for l in range(L):      # unrolled at trace time (L = 3)
            r = o_we + l * we_stride
            we = slab_ref[r:r + Fe, 0:H].astype(bf16)              # (Fe, H)
            r = o_w1 + l * H2
            w1 = slab_ref[r:r + H2, 0:H2].astype(bf16)             # (2H, 2H)
            w1_top = slab_ref[r:r + H, 0:H2].astype(bf16)          # (H, 2H) self-loop x
            r = o_w2 + l * H2
            w2 = slab_ref[r:r + H2, 0:H].astype(bf16)              # (2H, H)
            r = o_vec + l * vec_stride
            b1 = slab_ref[r + 0:r + 1, 0:H2]     # = b1 + sl_e @ w1[H:2H,:]  (folded)
            gamma = slab_ref[r + 1:r + 2, 0:H2]
            beta = slab_ref[r + 2:r + 3, 0:H2]
            be = slab_ref[r + 3:r + 4, 0:H]
            b2 = slab_ref[r + 4:r + 5, 0:H]

            hb = h.astype(bf16)

            # edge_embeddings = edge_encoder(edge_attr): Linear(Fe -> H)
            ee = jnp.dot(ea, we, preferred_element_type=f32) + be              # (E, H)
            # x[edge_index[1]] : exact 0/1 one-hot gather on the MXU
            xg = jnp.dot(g, hb, preferred_element_type=f32)                    # (E, H)
            # concat([x_gathered, edge_embeddings]) + ONE combined scatter-sum
            # onto edge_index[0] (sum aggregation)
            feat = jnp.concatenate([xg, ee], axis=-1).astype(bf16)             # (E, 2H)
            agg = jnp.dot(s, feat, preferred_element_type=f32)                 # (N, 2H)

            # mlp[0] Linear(2H -> 2H).  Self-loop contributions are folded:
            #   * x self-loop    -> extra h @ w1[:H, :] matmul
            #   * edge self-loop -> compile-time constant folded into b1 (wrapper)
            z = (jnp.dot(agg.astype(bf16), w1, preferred_element_type=f32)
                 + jnp.dot(hb, w1_top, preferred_element_type=f32) + b1)       # (N, 2H)

            # mlp[1] BatchNorm1d(2H): training-mode batch stats, biased variance.
            # One fused pass: [sum(z), sum(z*z)] via a single ones-row MXU matmul.
            stats = jnp.dot(ones_n, jnp.concatenate([z, z * z], axis=-1),
                            preferred_element_type=f32)                        # (1, 4H)
            mean = stats[:, :H2] * inv_n
            var = stats[:, H2:] * inv_n - mean * mean
            z = (z - mean) * jax.lax.rsqrt(var + EPS) * gamma + beta
            # mlp[2] ReLU
            z = jnp.maximum(z, 0.0)
            # mlp[3] Linear(2H -> H)
            h = jnp.dot(z.astype(bf16), w2, preferred_element_type=f32) + b2   # (N, H)
            # inter-layer F.relu (skipped on the last layer); dropout p=0 -> identity
            if l != L - 1:
                h = jnp.maximum(h, 0.0)

        # graph mean pooling + prediction head.  Head weight is already folded
        # (cat([pooled, pooled]) @ Wp == pooled @ (Wp[:H] + Wp[H:])) and padded to
        # 128 lanes in the wrapper -> unmasked, lane-dense output store.
        pooled = jnp.dot(pm_ref[...], h, preferred_element_type=f32)           # (Bp, H)
        wp = slab_ref[o_wp:o_wp + H, :]                                        # (H, 128)
        bp = slab_ref[o_bp:o_bp + 1, :]                                        # (1, 128)
        out_ref[...] = jnp.dot(pooled, wp, preferred_element_type=f32) + bp

    return kernel


def gnn_pred_forward(x_idx, edge_index, edge_attr, batch, params,
                     self_loop_index, self_loop_type, num_graphs):
    """JAX glue: embedding lookup, operator construction, weight-slab packing."""
    f32, bf16 = jnp.float32, jnp.bfloat16
    N = int(x_idx.shape[0])
    E = int(edge_index.shape[1])
    Fe = int(edge_attr.shape[1])
    layers = params["layers"]
    L = len(layers)
    H = int(params["node_emb"].shape[1])
    H2 = 2 * H
    T = int(params["wp"].shape[1])
    LANES = 128
    assert H2 <= LANES and self_loop_index < Fe
    Bp = _ceil_to(max(num_graphs, 1), 8)       # sublane-dense output rows

    # layer-0 input_node_embeddings lookup (Embedding(input_layer, H))
    h0 = jnp.take(params["node_emb"], x_idx, axis=0).astype(f32)        # (N, H)

    # Exact 0/1 one-hot gather/scatter operators for the REAL edges only
    # (self-loops are folded analytically into the per-layer weights/bias).
    G = jax.nn.one_hot(edge_index[1], N, dtype=bf16)                    # (E, N)
    S = jax.nn.one_hot(edge_index[0], N, dtype=bf16).T                  # (N, E)
    ea = edge_attr.astype(bf16)                                         # 0/1 -> exact

    # batch mean-pooling matrix, padded to Bp rows (extra rows are all-zero).
    Pm = jax.nn.one_hot(batch, Bp, dtype=f32).T                         # (Bp, N)
    Pm = Pm / jnp.maximum(jnp.sum(Pm, axis=1, keepdims=True), 1.0)

    # ---- pack all weights/biases into one f32 slab (one DMA instead of six) ----
    def row_block(m, rows):
        m = jnp.asarray(m, f32)
        return jnp.pad(m, ((0, rows - m.shape[0]), (0, LANES - m.shape[1])))

    we_stride = _ceil_to(Fe, 8)
    vec_stride = 8
    o_we = 0
    o_w1 = o_we + L * we_stride
    o_w2 = o_w1 + L * H2
    o_vec = o_w2 + L * H2
    o_wp = o_vec + L * vec_stride
    o_bp = o_wp + H
    n_rows = _ceil_to(o_bp + 1, 8)

    slt = jnp.asarray(self_loop_type, f32)
    blocks = []
    for lp in layers:
        blocks.append(row_block(lp["we"], we_stride))
    for lp in layers:
        blocks.append(row_block(lp["w1"], H2))
    for lp in layers:
        blocks.append(row_block(lp["w2"], H2))
    for lp in layers:
        # self-loop edge embedding  edge_encoder(self_loop_attr) = we[sli]*type + be,
        # folded into the first mlp bias:  b1_eff = b1 + sl_e @ w1[H:2H, :]
        sl_e = lp["we"][self_loop_index:self_loop_index + 1, :] * slt + lp["be"]
        b1_eff = lp["b1"] + sl_e @ lp["w1"][H:H2, :]
        vec = jnp.concatenate(
            [b1_eff, lp["gamma"], lp["beta"],
             jnp.pad(lp["be"], ((0, 0), (0, H))),
             jnp.pad(lp["b2"], ((0, 0), (0, H)))], axis=0)               # (5, 2H)
        blocks.append(row_block(vec, vec_stride))
    # head: graph_rep = cat([pooled, pooled]) -> fold the two weight halves,
    # pad num_tasks up to 128 lanes for a lane-dense output store.
    wp_fold = params["wp"][:H] + params["wp"][H:]                        # (H, T)
    blocks.append(row_block(wp_fold, H))
    blocks.append(row_block(params["bp"], n_rows - o_bp))
    slab = jnp.concatenate(blocks, axis=0)                               # (n_rows, 128)

    kernel = make_fused_kernel(
        N, E, H, Fe, L,
        (o_we, we_stride, o_w1, o_w2, o_vec, vec_stride, o_wp, o_bp))

    inputs = (h0, ea, G, S, Pm, slab)
    in_bytes = sum(int(a.size) * a.dtype.itemsize for a in inputs)
    out_bytes = Bp * LANES * 4
    flops = L * (2 * E * Fe * H + 2 * E * N * H + 2 * N * E * H2
                 + 2 * N * H2 * H2 + 2 * N * H * H2 + 2 * N * H2 * H
                 + 2 * N * 2 * H2)
    flops += 2 * Bp * N * H + 2 * Bp * H * LANES
    vmem_limit = int(min(100 * 1024 * 1024,
                         max(16 * 1024 * 1024, 8 * (in_bytes + out_bytes))))

    out = pl.pallas_call(
        kernel,
        out_shape=jax.ShapeDtypeStruct((Bp, LANES), f32),
        in_specs=[_vmem() for _ in inputs],
        out_specs=_vmem(),
        compiler_params=pltpu.CompilerParams(vmem_limit_bytes=vmem_limit),
        cost_estimate=pl.CostEstimate(flops=int(flops),
                                      transcendentals=int(L * H2),
                                      bytes_accessed=int(in_bytes + out_bytes)),
    )(*inputs)
    return out[:num_graphs, :T]


def reference_forward(x_idx, edge_index, edge_attr, batch, params,
                      self_loop_index, self_loop_type, num_graphs):
    """Pure-JAX f32 reference following the PyTorch module exactly."""
    N = x_idx.shape[0]
    layers = params["layers"]
    L = len(layers)
    h = params["node_emb"][x_idx].astype(jnp.float32)
    loops = jnp.arange(N, dtype=edge_index.dtype)
    ei = jnp.concatenate([edge_index, jnp.stack([loops, loops])], axis=1)
    sl_attr = jnp.zeros((N, edge_attr.shape[1]), jnp.float32)
    sl_attr = sl_attr.at[:, self_loop_index].set(self_loop_type)
    ea = jnp.concatenate([edge_attr.astype(jnp.float32), sl_attr], axis=0)
    for i, lp in enumerate(layers):
        ee = ea @ lp["we"] + lp["be"]
        msg = jnp.concatenate([h[ei[1]], ee], axis=1)
        agg = jax.ops.segment_sum(msg, ei[0], num_segments=N)
        z = agg @ lp["w1"] + lp["b1"]
        mean = jnp.mean(z, axis=0, keepdims=True)
        var = jnp.mean((z - mean) ** 2, axis=0, keepdims=True)
        z = (z - mean) / jnp.sqrt(var + EPS) * lp["gamma"] + lp["beta"]
        z = jnp.maximum(z, 0.0)
        h = z @ lp["w2"] + lp["b2"]
        if i != L - 1:
            h = jnp.maximum(h, 0.0)
    Pm = jax.nn.one_hot(batch, num_graphs, dtype=jnp.float32).T
    Pm = Pm / jnp.maximum(jnp.sum(Pm, axis=1, keepdims=True), 1.0)
    pooled = Pm @ h
    graph_rep = jnp.concatenate([pooled, pooled], axis=1)
    return graph_rep @ params["wp"] + params["bp"]


def init_params(key, num_layers, hidden, num_tasks, edge_encode, input_layer):
    H = hidden
    keys = jax.random.split(key, 2 + num_layers)
    params = {
        "node_emb": jax.random.normal(keys[0], (input_layer, H), jnp.float32) * 0.1,
    }
    layers = []
    for i in range(num_layers):
        k = jax.random.split(keys[2 + i], 3)
        layers.append(dict(
            we=jax.random.normal(k[0], (edge_encode, H), jnp.float32) * 0.1,
            be=jnp.zeros((1, H), jnp.float32),
            w1=jax.random.normal(k[1], (2 * H, 2 * H), jnp.float32) * 0.1,
            b1=jnp.zeros((1, 2 * H), jnp.float32),
            gamma=jnp.ones((1, 2 * H), jnp.float32),    # BatchNorm1d init
            beta=jnp.zeros((1, 2 * H), jnp.float32),
            w2=jax.random.normal(k[2], (2 * H, H), jnp.float32) * 0.1,
            b2=jnp.zeros((1, H), jnp.float32),
        ))
    params["layers"] = layers
    params["wp"] = jax.random.normal(keys[1], (2 * H, num_tasks), jnp.float32) * 0.1
    params["bp"] = jnp.zeros((1, num_tasks), jnp.float32)
    return params


if __name__ == "__main__":
    key = jax.random.PRNGKey(0)
    # Several graphs batched into ONE call (launch/DMA amortization is the main
    # throughput lever at small sizes).
    NUM_GRAPHS = 4
    N, E = 64, 128                      # total nodes / edges across the batch
    H, T = 32, 4                        # hidden_size, num_tasks
    EDGE_ENCODE, INPUT_LAYER = 9, 2     # Bio config
    NUM_LAYERS = 3
    SELF_LOOP_INDEX, SELF_LOOP_TYPE = 7, 1.0

    k1, k2, k3, kp = jax.random.split(key, 4)
    x_idx = jax.random.randint(k1, (N,), 0, INPUT_LAYER, dtype=jnp.int32)
    edge_index = jax.random.randint(k2, (2, E), 0, N, dtype=jnp.int32)
    edge_attr = (jax.random.uniform(k3, (E, EDGE_ENCODE)) > 0.5).astype(jnp.float32)
    batch = jnp.repeat(jnp.arange(NUM_GRAPHS, dtype=jnp.int32), N // NUM_GRAPHS)

    params = init_params(kp, NUM_LAYERS, H, T, EDGE_ENCODE, INPUT_LAYER)

    out = gnn_pred_forward(x_idx, edge_index, edge_attr, batch, params,
                           SELF_LOOP_INDEX, SELF_LOOP_TYPE, NUM_GRAPHS)
    out = jax.block_until_ready(out)
    assert out.shape == (NUM_GRAPHS, T) and out.dtype == jnp.float32
    assert bool(jnp.all(jnp.isfinite(out)))

    # Tolerance check vs the pure f32 reference (kernel uses bf16 MXU operands:
    # G/S/edge_attr are exact 0/1; weights/activations are rounded -> small drift).
    ref = reference_forward(x_idx, edge_index, edge_attr, batch, params,
                            SELF_LOOP_INDEX, SELF_LOOP_TYPE, NUM_GRAPHS)
    err = float(jnp.max(jnp.abs(out - ref)))
    scale = float(jnp.max(jnp.abs(ref))) + 1e-3
    assert err <= 0.05 * scale + 5e-2, (err, scale)
    print("KERNEL_OK")
</pallas_src>

<mosaic_0001>
module attributes {stable_mosaic.version = 11 : i64} {
  func.func @kernel(%arg0: memref<64x32xf32, #tpu.memory_space<vmem>>, %arg1: memref<128x9xbf16, #tpu.memory_space<vmem>>, %arg2: memref<128x64xbf16, #tpu.memory_space<vmem>>, %arg3: memref<64x128xbf16, #tpu.memory_space<vmem>>, %arg4: memref<8x64xf32, #tpu.memory_space<vmem>>, %arg5: memref<496x128xf32, #tpu.memory_space<vmem>>, %arg6: memref<8x128xf32, #tpu.memory_space<vmem>>) attributes {dimension_semantics = [], scalar_prefetch = 0 : i64, scratch_operands = 0 : i64, tpu.core_type = #tpu.core_type<tc>} {
    %c0 = arith.constant 0 : index
    %c0_0 = arith.constant 0 : index
    %0 = vector.load %arg0[%c0, %c0_0] : memref<64x32xf32, #tpu.memory_space<vmem>>, vector<64x32xf32>
    %c0_1 = arith.constant 0 : index
    %c0_2 = arith.constant 0 : index
    %1 = vector.load %arg1[%c0_1, %c0_2] : memref<128x9xbf16, #tpu.memory_space<vmem>>, vector<128x9xbf16>
    %c0_3 = arith.constant 0 : index
    %c0_4 = arith.constant 0 : index
    %2 = vector.load %arg2[%c0_3, %c0_4] : memref<128x64xbf16, #tpu.memory_space<vmem>>, vector<128x64xbf16>
    %c0_5 = arith.constant 0 : index
    %c0_6 = arith.constant 0 : index
    %3 = vector.load %arg3[%c0_5, %c0_6] : memref<64x128xbf16, #tpu.memory_space<vmem>>, vector<64x128xbf16>
    %cst = arith.constant 1.000000e+00 : f32
    %4 = vector.broadcast %cst : f32 to vector<1x64xf32>
    %c0_7 = arith.constant 0 : index
    %c0_8 = arith.constant 0 : index
    %5 = vector.load %arg5[%c0_7, %c0_8] : memref<496x128xf32, #tpu.memory_space<vmem>>, vector<9x32xf32>
    %6 = arith.truncf %5 : vector<9x32xf32> to vector<9x32xbf16>
    %c48 = arith.constant 48 : index
    %c0_9 = arith.constant 0 : index
    %7 = vector.load %arg5[%c48, %c0_9] : memref<496x128xf32, #tpu.memory_space<vmem>>, vector<64x64xf32>
    %8 = arith.truncf %7 : vector<64x64xf32> to vector<64x64xbf16>
    %c48_10 = arith.constant 48 : index
    %c0_11 = arith.constant 0 : index
    %9 = vector.load %arg5[%c48_10, %c0_11] : memref<496x128xf32, #tpu.memory_space<vmem>>, vector<32x64xf32>
    %10 = arith.truncf %9 : vector<32x64xf32> to vector<32x64xbf16>
    %c240 = arith.constant 240 : index
    %c0_12 = arith.constant 0 : index
    %11 = vector.load %arg5[%c240, %c0_12] : memref<496x128xf32, #tpu.memory_space<vmem>>, vector<64x32xf32>
    %12 = arith.truncf %11 : vector<64x32xf32> to vector<64x32xbf16>
    %c432 = arith.constant 432 : index
    %c0_13 = arith.constant 0 : index
    %13 = vector.load %arg5[%c432, %c0_13] : memref<496x128xf32, #tpu.memory_space<vmem>>, vector<1x64xf32>
    %c433 = arith.constant 433 : index
    %c0_14 = arith.constant 0 : index
    %14 = vector.load %arg5[%c433, %c0_14] : memref<496x128xf32, #tpu.memory_space<vmem>>, vector<1x64xf32>
    %c434 = arith.constant 434 : index
    %c0_15 = arith.constant 0 : index
    %15 = vector.load %arg5[%c434, %c0_15] : memref<496x128xf32, #tpu.memory_space<vmem>>, vector<1x64xf32>
    %c435 = arith.constant 435 : index
    %c0_16 = arith.constant 0 : index
    %16 = vector.load %arg5[%c435, %c0_16] : memref<496x128xf32, #tpu.memory_space<vmem>>, vector<1x32xf32>
    %c436 = arith.constant 436 : index
    %c0_17 = arith.constant 0 : index
    %17 = vector.load %arg5[%c436, %c0_17] : memref<496x128xf32, #tpu.memory_space<vmem>>, vector<1x32xf32>
    %18 = arith.truncf %0 : vector<64x32xf32> to vector<64x32xbf16>
    %cst_18 = arith.constant dense<0.000000e+00> : vector<128x32xf32>
    %19 = tpu.matmul %1, %6, %cst_18 {dimension_numbers = #tpu.dot_dimension_numbers<[1], [0], [0], [1], [0, 0, 1, 1], [], []>} : vector<128x9xbf16>, vector<9x32xbf16>, vector<128x32xf32> -> vector<128x32xf32>
    %20 = vector.broadcast %16 : vector<1x32xf32> to vector<128x32xf32>
    %21 = arith.addf %19, %20 : vector<128x32xf32>
    %cst_19 = arith.constant dense<0.000000e+00> : vector<128x32xf32>
    %22 = tpu.matmul %2, %18, %cst_19 {dimension_numbers = #tpu.dot_dimension_numbers<[1], [0], [0], [1], [0, 0, 1, 1], [], []>} : vector<128x64xbf16>, vector<64x32xbf16>, vector<128x32xf32> -> vector<128x32xf32>
    %23 = tpu.concatenate %22, %21 in 1 : vector<128x32xf32>, vector<128x32xf32> -> vector<128x64xf32>
    %24 = arith.truncf %23 : vector<128x64xf32> to vector<128x64xbf16>
    %cst_20 = arith.constant dense<0.000000e+00> : vector<64x64xf32>
    %25 = tpu.matmul %3, %24, %cst_20 {dimension_numbers = #tpu.dot_dimension_numbers<[1], [0], [0], [1], [0, 0, 1, 1], [], []>} : vector<64x128xbf16>, vector<128x64xbf16>, vector<64x64xf32> -> vector<64x64xf32>
    %26 = arith.truncf %25 : vector<64x64xf32> to vector<64x64xbf16>
    %cst_21 = arith.constant dense<0.000000e+00> : vector<64x64xf32>
    %27 = tpu.matmul %26, %8, %cst_21 {dimension_numbers = #tpu.dot_dimension_numbers<[1], [0], [0], [1], [0, 0, 1, 1], [], []>} : vector<64x64xbf16>, vector<64x64xbf16>, vector<64x64xf32> -> vector<64x64xf32>
    %cst_22 = arith.constant dense<0.000000e+00> : vector<64x64xf32>
    %28 = tpu.matmul %18, %10, %cst_22 {dimension_numbers = #tpu.dot_dimension_numbers<[1], [0], [0], [1], [0, 0, 1, 1], [], []>} : vector<64x32xbf16>, vector<32x64xbf16>, vector<64x64xf32> -> vector<64x64xf32>
    %29 = arith.addf %27, %28 : vector<64x64xf32>
    %30 = vector.broadcast %13 : vector<1x64xf32> to vector<64x64xf32>
    %31 = arith.addf %29, %30 : vector<64x64xf32>
    %32 = arith.mulf %31, %31 : vector<64x64xf32>
    %33 = tpu.concatenate %31, %32 in 1 : vector<64x64xf32>, vector<64x64xf32> -> vector<64x128xf32>
    %cst_23 = arith.constant dense<0.000000e+00> : vector<1x128xf32>
    %34 = tpu.matmul %4, %33, %cst_23 {dimension_numbers = #tpu.dot_dimension_numbers<[1], [0], [0], [1], [0, 0, 1, 1], [], []>} : vector<1x64xf32>, vector<64x128xf32>, vector<1x128xf32> -> vector<1x128xf32>
    %35 = vector.extract_strided_slice %34 {offsets = [0, 0], sizes = [1, 64], strides = [1, 1]} : vector<1x128xf32> to vector<1x64xf32>
    %cst_24 = arith.constant 1.562500e-02 : f32
    %36 = vector.broadcast %cst_24 : f32 to vector<1x64xf32>
    %37 = arith.mulf %35, %36 : vector<1x64xf32>
    %38 = vector.extract_strided_slice %34 {offsets = [0, 64], sizes = [1, 64], strides = [1, 1]} : vector<1x128xf32> to vector<1x64xf32>
    %cst_25 = arith.constant 1.562500e-02 : f32
    %39 = vector.broadcast %cst_25 : f32 to vector<1x64xf32>
    %40 = arith.mulf %38, %39 : vector<1x64xf32>
    %41 = arith.mulf %37, %37 : vector<1x64xf32>
    %42 = arith.subf %40, %41 : vector<1x64xf32>
    %43 = vector.broadcast %37 : vector<1x64xf32> to vector<64x64xf32>
    %44 = arith.subf %31, %43 : vector<64x64xf32>
    %cst_26 = arith.constant 9.99999974E-6 : f32
    %45 = vector.broadcast %cst_26 : f32 to vector<1x64xf32>
    %46 = arith.addf %42, %45 : vector<1x64xf32>
    %47 = math.rsqrt %46 : vector<1x64xf32>
    %48 = vector.broadcast %47 : vector<1x64xf32> to vector<64x64xf32>
    %49 = arith.mulf %44, %48 : vector<64x64xf32>
    %50 = vector.broadcast %14 : vector<1x64xf32> to vector<64x64xf32>
    %51 = arith.mulf %49, %50 : vector<64x64xf32>
    %52 = vector.broadcast %15 : vector<1x64xf32> to vector<64x64xf32>
    %53 = arith.addf %51, %52 : vector<64x64xf32>
    %cst_27 = arith.constant 0.000000e+00 : f32
    %54 = vector.broadcast %cst_27 : f32 to vector<64x64xf32>
    %55 = arith.maximumf %53, %54 : vector<64x64xf32>
    %56 = arith.truncf %55 : vector<64x64xf32> to vector<64x64xbf16>
    %cst_28 = arith.constant dense<0.000000e+00> : vector<64x32xf32>
    %57 = tpu.matmul %56, %12, %cst_28 {dimension_numbers = #tpu.dot_dimension_numbers<[1], [0], [0], [1], [0, 0, 1, 1], [], []>} : vector<64x64xbf16>, vector<64x32xbf16>, vector<64x32xf32> -> vector<64x32xf32>
    %58 = vector.broadcast %17 : vector<1x32xf32> to vector<64x32xf32>
    %59 = arith.addf %57, %58 : vector<64x32xf32>
    %cst_29 = arith.constant 0.000000e+00 : f32
    %60 = vector.broadcast %cst_29 : f32 to vector<64x32xf32>
    %61 = arith.maximumf %59, %60 : vector<64x32xf32>
    %c16 = arith.constant 16 : index
    %c0_30 = arith.constant 0 : index
    %62 = vector.load %arg5[%c16, %c0_30] : memref<496x128xf32, #tpu.memory_space<vmem>>, vector<9x32xf32>
    %63 = arith.truncf %62 : vector<9x32xf32> to vector<9x32xbf16>
    %c112 = arith.constant 112 : index
    %c0_31 = arith.constant 0 : index
    %64 = vector.load %arg5[%c112, %c0_31] : memref<496x128xf32, #tpu.memory_space<vmem>>, vector<64x64xf32>
    %65 = arith.truncf %64 : vector<64x64xf32> to vector<64x64xbf16>
    %c112_32 = arith.constant 112 : index
    %c0_33 = arith.constant 0 : index
    %66 = vector.load %arg5[%c112_32, %c0_33] : memref<496x128xf32, #tpu.memory_space<vmem>>, vector<32x64xf32>
    %67 = arith.truncf %66 : vector<32x64xf32> to vector<32x64xbf16>
    %c304 = arith.constant 304 : index
    %c0_34 = arith.constant 0 : index
    %68 = vector.load %arg5[%c304, %c0_34] : memref<496x128xf32, #tpu.memory_space<vmem>>, vector<64x32xf32>
    %69 = arith.truncf %68 : vector<64x32xf32> to vector<64x32xbf16>
    %c440 = arith.constant 440 : index
    %c0_35 = arith.constant 0 : index
    %70 = vector.load %arg5[%c440, %c0_35] : memref<496x128xf32, #tpu.memory_space<vmem>>, vector<1x64xf32>
    %c441 = arith.constant 441 : index
    %c0_36 = arith.constant 0 : index
    %71 = vector.load %arg5[%c441, %c0_36] : memref<496x128xf32, #tpu.memory_space<vmem>>, vector<1x64xf32>
    %c442 = arith.constant 442 : index
    %c0_37 = arith.constant 0 : index
    %72 = vector.load %arg5[%c442, %c0_37] : memref<496x128xf32, #tpu.memory_space<vmem>>, vector<1x64xf32>
    %c443 = arith.constant 443 : index
    %c0_38 = arith.constant 0 : index
    %73 = vector.load %arg5[%c443, %c0_38] : memref<496x128xf32, #tpu.memory_space<vmem>>, vector<1x32xf32>
    %c444 = arith.constant 444 : index
    %c0_39 = arith.constant 0 : index
    %74 = vector.load %arg5[%c444, %c0_39] : memref<496x128xf32, #tpu.memory_space<vmem>>, vector<1x32xf32>
    %75 = arith.truncf %61 : vector<64x32xf32> to vector<64x32xbf16>
    %cst_40 = arith.constant dense<0.000000e+00> : vector<128x32xf32>
    %76 = tpu.matmul %1, %63, %cst_40 {dimension_numbers = #tpu.dot_dimension_numbers<[1], [0], [0], [1], [0, 0, 1, 1], [], []>} : vector<128x9xbf16>, vector<9x32xbf16>, vector<128x32xf32> -> vector<128x32xf32>
    %77 = vector.broadcast %73 : vector<1x32xf32> to vector<128x32xf32>
    %78 = arith.addf %76, %77 : vector<128x32xf32>
    %cst_41 = arith.constant dense<0.000000e+00> : vector<128x32xf32>
    %79 = tpu.matmul %2, %75, %cst_41 {dimension_numbers = #tpu.dot_dimension_numbers<[1], [0], [0], [1], [0, 0, 1, 1], [], []>} : vector<128x64xbf16>, vector<64x32xbf16>, vector<128x32xf32> -> vector<128x32xf32>
    %80 = tpu.concatenate %79, %78 in 1 : vector<128x32xf32>, vector<128x32xf32> -> vector<128x64xf32>
    %81 = arith.truncf %80 : vector<128x64xf32> to vector<128x64xbf16>
    %cst_42 = arith.constant dense<0.000000e+00> : vector<64x64xf32>
    %82 = tpu.matmul %3, %81, %cst_42 {dimension_numbers = #tpu.dot_dimension_numbers<[1], [0], [0], [1], [0, 0, 1, 1], [], []>} : vector<64x128xbf16>, vector<128x64xbf16>, vector<64x64xf32> -> vector<64x64xf32>
    %83 = arith.truncf %82 : vector<64x64xf32> to vector<64x64xbf16>
    %cst_43 = arith.constant dense<0.000000e+00> : vector<64x64xf32>
    %84 = tpu.matmul %83, %65, %cst_43 {dimension_numbers = #tpu.dot_dimension_numbers<[1], [0], [0], [1], [0, 0, 1, 1], [], []>} : vector<64x64xbf16>, vector<64x64xbf16>, vector<64x64xf32> -> vector<64x64xf32>
    %cst_44 = arith.constant dense<0.000000e+00> : vector<64x64xf32>
    %85 = tpu.matmul %75, %67, %cst_44 {dimension_numbers = #tpu.dot_dimension_numbers<[1], [0], [0], [1], [0, 0, 1, 1], [], []>} : vector<64x32xbf16>, vector<32x64xbf16>, vector<64x64xf32> -> vector<64x64xf32>
    %86 = arith.addf %84, %85 : vector<64x64xf32>
    %87 = vector.broadcast %70 : vector<1x64xf32> to vector<64x64xf32>
    %88 = arith.addf %86, %87 : vector<64x64xf32>
    %89 = arith.mulf %88, %88 : vector<64x64xf32>
    %90 = tpu.concatenate %88, %89 in 1 : vector<64x64xf32>, vector<64x64xf32> -> vector<64x128xf32>
    %cst_45 = arith.constant dense<0.000000e+00> : vector<1x128xf32>
    %91 = tpu.matmul %4, %90, %cst_45 {dimension_numbers = #tpu.dot_dimension_numbers<[1], [0], [0], [1], [0, 0, 1, 1], [], []>} : vector<1x64xf32>, vector<64x128xf32>, vector<1x128xf32> -> vector<1x128xf32>
    %92 = vector.extract_strided_slice %91 {offsets = [0, 0], sizes = [1, 64], strides = [1, 1]} : vector<1x128xf32> to vector<1x64xf32>
    %cst_46 = arith.constant 1.562500e-02 : f32
    %93 = vector.broadcast %cst_46 : f32 to vector<1x64xf32>
    %94 = arith.mulf %92, %93 : vector<1x64xf32>
    %95 = vector.extract_strided_slice %91 {offsets = [0, 64], sizes = [1, 64], strides = [1, 1]} : vector<1x128xf32> to vector<1x64xf32>
    %cst_47 = arith.constant 1.562500e-02 : f32
    %96 = vector.broadcast %cst_47 : f32 to vector<1x64xf32>
    %97 = arith.mulf %95, %96 : vector<1x64xf32>
    %98 = arith.mulf %94, %94 : vector<1x64xf32>
    %99 = arith.subf %97, %98 : vector<1x64xf32>
    %100 = vector.broadcast %94 : vector<1x64xf32> to vector<64x64xf32>
    %101 = arith.subf %88, %100 : vector<64x64xf32>
    %cst_48 = arith.constant 9.99999974E-6 : f32
    %102 = vector.broadcast %cst_48 : f32 to vector<1x64xf32>
    %103 = arith.addf %99, %102 : vector<1x64xf32>
    %104 = math.rsqrt %103 : vector<1x64xf32>
    %105 = vector.broadcast %104 : vector<1x64xf32> to vector<64x64xf32>
    %106 = arith.mulf %101, %105 : vector<64x64xf32>
    %107 = vector.broadcast %71 : vector<1x64xf32> to vector<64x64xf32>
    %108 = arith.mulf %106, %107 : vector<64x64xf32>
    %109 = vector.broadcast %72 : vector<1x64xf32> to vector<64x64xf32>
    %110 = arith.addf %108, %109 : vector<64x64xf32>
    %cst_49 = arith.constant 0.000000e+00 : f32
    %111 = vector.broadcast %cst_49 : f32 to vector<64x64xf32>
    %112 = arith.maximumf %110, %111 : vector<64x64xf32>
    %113 = arith.truncf %112 : vector<64x64xf32> to vector<64x64xbf16>
    %cst_50 = arith.constant dense<0.000000e+00> : vector<64x32xf32>
    %114 = tpu.matmul %113, %69, %cst_50 {dimension_numbers = #tpu.dot_dimension_numbers<[1], [0], [0], [1], [0, 0, 1, 1], [], []>} : vector<64x64xbf16>, vector<64x32xbf16>, vector<64x32xf32> -> vector<64x32xf32>
    %115 = vector.broadcast %74 : vector<1x32xf32> to vector<64x32xf32>
    %116 = arith.addf %114, %115 : vector<64x32xf32>
    %cst_51 = arith.constant 0.000000e+00 : f32
    %117 = vector.broadcast %cst_51 : f32 to vector<64x32xf32>
    %118 = arith.maximumf %116, %117 : vector<64x32xf32>
    %c32 = arith.constant 32 : index
    %c0_52 = arith.constant 0 : index
    %119 = vector.load %arg5[%c32, %c0_52] : memref<496x128xf32, #tpu.memory_space<vmem>>, vector<9x32xf32>
    %120 = arith.truncf %119 : vector<9x32xf32> to vector<9x32xbf16>
    %c176 = arith.constant 176 : index
    %c0_53 = arith.constant 0 : index
    %121 = vector.load %arg5[%c176, %c0_53] : memref<496x128xf32, #tpu.memory_space<vmem>>, vector<64x64xf32>
    %122 = arith.truncf %121 : vector<64x64xf32> to vector<64x64xbf16>
    %c176_54 = arith.constant 176 : index
    %c0_55 = arith.constant 0 : index
    %123 = vector.load %arg5[%c176_54, %c0_55] : memref<496x128xf32, #tpu.memory_space<vmem>>, vector<32x64xf32>
    %124 = arith.truncf %123 : vector<32x64xf32> to vector<32x64xbf16>
    %c368 = arith.constant 368 : index
    %c0_56 = arith.constant 0 : index
    %125 = vector.load %arg5[%c368, %c0_56] : memref<496x128xf32, #tpu.memory_space<vmem>>, vector<64x32xf32>
    %126 = arith.truncf %125 : vector<64x32xf32> to vector<64x32xbf16>
    %c448 = arith.constant 448 : index
    %c0_57 = arith.constant 0 : index
    %127 = vector.load %arg5[%c448, %c0_57] : memref<496x128xf32, #tpu.memory_space<vmem>>, vector<1x64xf32>
    %c449 = arith.constant 449 : index
    %c0_58 = arith.constant 0 : index
    %128 = vector.load %arg5[%c449, %c0_58] : memref<496x128xf32, #tpu.memory_space<vmem>>, vector<1x64xf32>
    %c450 = arith.constant 450 : index
    %c0_59 = arith.constant 0 : index
    %129 = vector.load %arg5[%c450, %c0_59] : memref<496x128xf32, #tpu.memory_space<vmem>>, vector<1x64xf32>
    %c451 = arith.constant 451 : index
    %c0_60 = arith.constant 0 : index
    %130 = vector.load %arg5[%c451, %c0_60] : memref<496x128xf32, #tpu.memory_space<vmem>>, vector<1x32xf32>
    %c452 = arith.constant 452 : index
    %c0_61 = arith.constant 0 : index
    %131 = vector.load %arg5[%c452, %c0_61] : memref<496x128xf32, #tpu.memory_space<vmem>>, vector<1x32xf32>
    %132 = arith.truncf %118 : vector<64x32xf32> to vector<64x32xbf16>
    %cst_62 = arith.constant dense<0.000000e+00> : vector<128x32xf32>
    %133 = tpu.matmul %1, %120, %cst_62 {dimension_numbers = #tpu.dot_dimension_numbers<[1], [0], [0], [1], [0, 0, 1, 1], [], []>} : vector<128x9xbf16>, vector<9x32xbf16>, vector<128x32xf32> -> vector<128x32xf32>
    %134 = vector.broadcast %130 : vector<1x32xf32> to vector<128x32xf32>
    %135 = arith.addf %133, %134 : vector<128x32xf32>
    %cst_63 = arith.constant dense<0.000000e+00> : vector<128x32xf32>
    %136 = tpu.matmul %2, %132, %cst_63 {dimension_numbers = #tpu.dot_dimension_numbers<[1], [0], [0], [1], [0, 0, 1, 1], [], []>} : vector<128x64xbf16>, vector<64x32xbf16>, vector<128x32xf32> -> vector<128x32xf32>
    %137 = tpu.concatenate %136, %135 in 1 : vector<128x32xf32>, vector<128x32xf32> -> vector<128x64xf32>
    %138 = arith.truncf %137 : vector<128x64xf32> to vector<128x64xbf16>
    %cst_64 = arith.constant dense<0.000000e+00> : vector<64x64xf32>
    %139 = tpu.matmul %3, %138, %cst_64 {dimension_numbers = #tpu.dot_dimension_numbers<[1], [0], [0], [1], [0, 0, 1, 1], [], []>} : vector<64x128xbf16>, vector<128x64xbf16>, vector<64x64xf32> -> vector<64x64xf32>
    %140 = arith.truncf %139 : vector<64x64xf32> to vector<64x64xbf16>
    %cst_65 = arith.constant dense<0.000000e+00> : vector<64x64xf32>
    %141 = tpu.matmul %140, %122, %cst_65 {dimension_numbers = #tpu.dot_dimension_numbers<[1], [0], [0], [1], [0, 0, 1, 1], [], []>} : vector<64x64xbf16>, vector<64x64xbf16>, vector<64x64xf32> -> vector<64x64xf32>
    %cst_66 = arith.constant dense<0.000000e+00> : vector<64x64xf32>
    %142 = tpu.matmul %132, %124, %cst_66 {dimension_numbers = #tpu.dot_dimension_numbers<[1], [0], [0], [1], [0, 0, 1, 1], [], []>} : vector<64x32xbf16>, vector<32x64xbf16>, vector<64x64xf32> -> vector<64x64xf32>
    %143 = arith.addf %141, %142 : vector<64x64xf32>
    %144 = vector.broadcast %127 : vector<1x64xf32> to vector<64x64xf32>
    %145 = arith.addf %143, %144 : vector<64x64xf32>
    %146 = arith.mulf %145, %145 : vector<64x64xf32>
    %147 = tpu.concatenate %145, %146 in 1 : vector<64x64xf32>, vector<64x64xf32> -> vector<64x128xf32>
    %cst_67 = arith.constant dense<0.000000e+00> : vector<1x128xf32>
    %148 = tpu.matmul %4, %147, %cst_67 {dimension_numbers = #tpu.dot_dimension_numbers<[1], [0], [0], [1], [0, 0, 1, 1], [], []>} : vector<1x64xf32>, vector<64x128xf32>, vector<1x128xf32> -> vector<1x128xf32>
    %149 = vector.extract_strided_slice %148 {offsets = [0, 0], sizes = [1, 64], strides = [1, 1]} : vector<1x128xf32> to vector<1x64xf32>
    %cst_68 = arith.constant 1.562500e-02 : f32
    %150 = vector.broadcast %cst_68 : f32 to vector<1x64xf32>
    %151 = arith.mulf %149, %150 : vector<1x64xf32>
    %152 = vector.extract_strided_slice %148 {offsets = [0, 64], sizes = [1, 64], strides = [1, 1]} : vector<1x128xf32> to vector<1x64xf32>
    %cst_69 = arith.constant 1.562500e-02 : f32
    %153 = vector.broadcast %cst_69 : f32 to vector<1x64xf32>
    %154 = arith.mulf %152, %153 : vector<1x64xf32>
    %155 = arith.mulf %151, %151 : vector<1x64xf32>
    %156 = arith.subf %154, %155 : vector<1x64xf32>
    %157 = vector.broadcast %151 : vector<1x64xf32> to vector<64x64xf32>
    %158 = arith.subf %145, %157 : vector<64x64xf32>
    %cst_70 = arith.constant 9.99999974E-6 : f32
    %159 = vector.broadcast %cst_70 : f32 to vector<1x64xf32>
    %160 = arith.addf %156, %159 : vector<1x64xf32>
    %161 = math.rsqrt %160 : vector<1x64xf32>
    %162 = vector.broadcast %161 : vector<1x64xf32> to vector<64x64xf32>
    %163 = arith.mulf %158, %162 : vector<64x64xf32>
    %164 = vector.broadcast %128 : vector<1x64xf32> to vector<64x64xf32>
    %165 = arith.mulf %163, %164 : vector<64x64xf32>
    %166 = vector.broadcast %129 : vector<1x64xf32> to vector<64x64xf32>
    %167 = arith.addf %165, %166 : vector<64x64xf32>
    %cst_71 = arith.constant 0.000000e+00 : f32
    %168 = vector.broadcast %cst_71 : f32 to vector<64x64xf32>
    %169 = arith.maximumf %167, %168 : vector<64x64xf32>
    %170 = arith.truncf %169 : vector<64x64xf32> to vector<64x64xbf16>
    %cst_72 = arith.constant dense<0.000000e+00> : vector<64x32xf32>
    %171 = tpu.matmul %170, %126, %cst_72 {dimension_numbers = #tpu.dot_dimension_numbers<[1], [0], [0], [1], [0, 0, 1, 1], [], []>} : vector<64x64xbf16>, vector<64x32xbf16>, vector<64x32xf32> -> vector<64x32xf32>
    %172 = vector.broadcast %131 : vector<1x32xf32> to vector<64x32xf32>
    %173 = arith.addf %171, %172 : vector<64x32xf32>
    %c0_73 = arith.constant 0 : index
    %c0_74 = arith.constant 0 : index
    %174 = vector.load %arg4[%c0_73, %c0_74] : memref<8x64xf32, #tpu.memory_space<vmem>>, vector<8x64xf32>
    %cst_75 = arith.constant dense<0.000000e+00> : vector<8x32xf32>
    %175 = tpu.matmul %174, %173, %cst_75 {dimension_numbers = #tpu.dot_dimension_numbers<[1], [0], [0], [1], [0, 0, 1, 1], [], []>} : vector<8x64xf32>, vector<64x32xf32>, vector<8x32xf32> -> vector<8x32xf32>
    %c456 = arith.constant 456 : index
    %c0_76 = arith.constant 0 : index
    %176 = vector.load %arg5[%c456, %c0_76] : memref<496x128xf32, #tpu.memory_space<vmem>>, vector<32x128xf32>
    %c488 = arith.constant 488 : index
    %c0_77 = arith.constant 0 : index
    %177 = vector.load %arg5[%c488, %c0_77] : memref<496x128xf32, #tpu.memory_space<vmem>>, vector<1x128xf32>
    %cst_78 = arith.constant dense<0.000000e+00> : vector<8x128xf32>
    %178 = tpu.matmul %175, %176, %cst_78 {dimension_numbers = #tpu.dot_dimension_numbers<[1], [0], [0], [1], [0, 0, 1, 1], [], []>} : vector<8x32xf32>, vector<32x128xf32>, vector<8x128xf32> -> vector<8x128xf32>
    %179 = vector.broadcast %177 : vector<1x128xf32> to vector<8x128xf32>
    %180 = arith.addf %178, %179 : vector<8x128xf32>
    %c0_79 = arith.constant 0 : index
    %c0_80 = arith.constant 0 : index
    %181 = vector.load %arg6[%c0_79, %c0_80] : memref<8x128xf32, #tpu.memory_space<vmem>>, vector<8x128xf32>
    tpu.vector_store %arg6[%c0_79, %c0_80], %180 {strides = array<i32>} : memref<8x128xf32, #tpu.memory_space<vmem>>, vector<8x128xf32>,
    return
  }
}

</mosaic_0001>

<bundles_post_ra>
// kernel: tpu_custom_call.1
= control target key start
LH: loop header
LB: loop body
LE: loop exit
PB: predicated region body
PF: predicated region fallthrough
CT: control target
= control target key end

     0   :  { %11 = vsyncpa [#allocation3], 0  ;;  %s4687_s0 = inlined_call_operand.vmem [shape: f32[64,32], index: 0, kind: input, shape index: {}]   ;;  %s4688_s1 = inlined_call_operand.vmem [shape: bf16[128,9], index: 1, kind: input, shape index: {}]   ;;  %s4689_s2 = inlined_call_operand.vmem [shape: bf16[128,64], index: 2, kind: input, shape index: {}]   ;;  %s4690_s3 = inlined_call_operand.vmem [shape: bf16[64,128], index: 3, kind: input, shape index: {}]   ;;  %s4691_s4 = inlined_call_operand.vmem [shape: f32[8,64], index: 4, kind: input, shape index: {}]   ;;  %s4692_s5 = inlined_call_operand.hbm [shape: f32[496,128], index: 5, kind: input, shape index: {}]   ;;  %s4693_s6 = inlined_call_operand.hbm [shape: f32[8,128], index: 6, kind: output, shape index: {}]  }
   0x1   :  { %12 = vsyncpa [#allocation4], 0  ;;  %s3901_s21 = smov [#allocation2]  }
   0x2   :  { %s28_s22 = sshll.u32 %s3901_s21, 4  ;;  %s29_s22 = int_to_ptr.vmem [resolvable:$true] %s28_s22 }
   0x3   :  { %s3865_s23 = scalar_lea.vmem %s29_s22, 7936  ;;  %p3870_p1 = scmp.lt.s32.totalorder %s29_s22, %s29_s22 }
   0x4   :  { %p3866_p0 = scmp.ne.s32.totalorder %s29_s22, %s3865_s23  ;;  %p3871_p2 = scmp.lt.s32.totalorder %s3865_s23, %s3865_s23 }
   0x6   :  { %p3872_p3 = por %p3871_p2, %p3870_p1 }
   0x8   :  { %p3873_p4 = pnand %p3872_p3, %p3866_p0 }
   0xa   :  { %3876 = shalt.err (!%p3873_p4)
}
   0xb   :  { %s3902_s24 = smov 128   ;;  %s3903_s25 = smov 8  }
   0xc   :  { %34 = dma.hbm_to_vmem [thread:$0]  %s4692_s5, 7936, %s29_s22, [#allocation3], %s3902_s24, %s3902_s24, %s3903_s25  }
   0xd   :  { %3897 = dma.done.wait [#allocation3], 7936  }
   0xe   :  { %3898 = vsyncadd [#allocation3], 4294959360  ;;  %vm192_vm0 = vcmask 1043456   ;;  %vm193_vm1 = vcmask 1044480   ;;  %v3904_v0 = vmov 65535   ;;  %vm167_vm2 = vcmask 72704  }
   0xf   :  { %v194_v1 = vsel %vm192_vm0, 4294967295, %v3904_v0  ;;  %v87_v2 = vld [vmem:[#allocation2] sm:$0xff]  ;;  %v88_v3 = vld [vmem:[#allocation2 + $0x8] sm:$0x1]  ;;  %v3967_v9 = vld [vmem:[%s4688_s1 + $0x10] sm:$0xff]   ;;  %vm336_vm3 = vcmask 523264  }
  0x10   :  { %v3949_v4 = vsel %vm193_vm1, %v194_v1, 0  ;;  %v89_v5 = vpack.c.bf16 %v88_v3, %v87_v2  ;;  %v3954_v6 = vld [vmem:[%s4688_s1] sm:$0xff]   ;;  %v3962_v8 = vld [vmem:[%s4688_s1 + $0x8] sm:$0xff]   ;;  %v45_v10 = vld [vmem:[%s4687_s0 + $0x30] sm:$0xff]  ;;  %vm522_vm4 = vcmask 261120   ;;  %s3905_s25 = smov 32  }
  0x11   :  { %3266 = vmatprep.mubr.msk.bf16.mxu0 %vm167_vm2, %v3954_v6  ;;  %v46_v11 = vld [vmem:[%s4687_s0 + $0x38] sm:$0xff]  ;;  %v43_v12 = vld [vmem:[%s4687_s0 + $0x20] sm:$0xff]  ;;  %v44_v13 = vld [vmem:[%s4687_s0 + $0x28] sm:$0xff]  ;;  %vm3908_vm5 = vmmov 0   ;;  %s3910_s22 = smov [#allocation5]  }
  0x12   :  { %v197_v7 = vand.u32 %v3949_v4, %v89_v5  ;;  %v3985_v14 = vpack.c.bf16 %v46_v11, %v45_v10  ;;  %v3987_v15 = vpack.c.bf16 %v44_v13, %v43_v12  ;;  %v41_v16 = vld [vmem:[%s4687_s0 + $0x10] sm:$0xff]  ;;  %v3995_v17 = vld [vmem:[%s4688_s1 + $0x18] sm:$0xff]   ;;  %v4004_v19 = vld [vmem:[%s4689_s2] sm:$0xff]   ;;  %s2924_s23 = sshll.u32 %s3910_s22, 4  ;;  %s2925_s23 = int_to_ptr.vmem [resolvable:$true] %s2924_s23 }
  0x13   :  { %v42_v18 = vld [vmem:[%s4687_s0 + $0x18] sm:$0xff]  ;;  %v4009_v20 = vld [vmem:[%s4688_s1 + $0x20] sm:$0xff]   ;;  %3290 = vmatprep.mubr.msk.bf16.mxu1 %vm336_vm3, %v4004_v19  ;;  %v40_v23 = vld [vmem:[%s4687_s0 + $0x8] sm:$0xff]  ;;  %s3877_s24 = scalar_lea.vmem %s2925_s23, 128  ;;  %p3882_p6 = scmp.lt.s32.totalorder %s2925_s23, %s2925_s23 }
  0x14   :  { %3264 = vmatprep.subr.bf16.mxu0 %v197_v7  ;;  %3282 = vmatprep.subr.bf16.mxu1 %v3985_v14  ;;  %v4013_v21 = vpack.c.bf16 %v42_v18, %v41_v16  ;;  %v39_v22 = vld [vmem:[%s4687_s0] sm:$0xff]  ;;  %v4032_v25 = vld [vmem:[%s4688_s1 + $0x28] sm:$0xff]   ;;  %v4038_v26 = vld [vmem:[%s4688_s1 + $0x30] sm:$0xff]   ;;  %s3907_s0 = smov 64   ;;  %p3878_p5 = scmp.ne.s32.totalorder %s2925_s23, %s3877_s24 }
  0x15   :  { %3265 = vmatpush3.bf16.msra.mxu0 %v197_v7  ;;  %3283 = vmatpush3.bf16.msra.mxu1 %v3985_v14  ;;  %v119_v24 = vpack.c.bf16 %v40_v23, %v39_v22  ;;  %v4043_v27 = vld [vmem:[%s4689_s2 + $0x8] sm:$0xff]   ;;  %v4050_v28 = vld [vmem:[%s4689_s2 + $0x10] sm:$0xff]   ;;  %v4059_v29 = vld [vmem:[%s4688_s1 + $0x38] sm:$0xff]   ;;  %p3883_p7 = scmp.lt.s32.totalorder %s3877_s24, %s3877_s24 }
  0x16   :  { %3284 = vmatprep.subr.bf16.mxu1 %v3987_v15  ;;  %v4066_v30 = vld [vmem:[%s4689_s2 + $0x18] sm:$0xff]   ;;  %v4073_v31 = vld [vmem:[%s4689_s2 + $0x20] sm:$0xff]   ;;  %v4082_v32 = vld [vmem:[%s4689_s2 + $0x28] sm:$0xff]  }
  0x17   :  { %v4087_v33 = vld [vmem:[%s4689_s2 + $0x30] sm:$0xff]   ;;  %v4096_v34 = vld [vmem:[%s4689_s2 + $0x38] sm:$0xff]   ;;  %v4112_v22 = vld [vmem:[%s4690_s3] sm:$0xff]   ;;  %p3884_p8 = por %p3883_p7, %p3882_p6 }
  0x18   :  { %3267 = vmatmul.mubr.msk.bf16.vlgmr.msra.gmra.mxu0 %vm167_vm2, %v3962_v8  ;;  %v2933_v45 = vld [vmem:[#allocation2 + $0x1b3] ss:$0 sm:$0xff]  ;;  %v92_v23 = vld [vmem:[#allocation2 + $0x40] sm:$0xff] }
  0x19   :  { %3270 = vmatprep.mubr.msk.bf16.mxu0 %vm167_vm2, %v3967_v9  ;;  %3285 = vmatpush3.bf16.msra.mxu1 %v3987_v15  ;;  %p3885_p9 = pnand %p3884_p8, %p3878_p5 }
  0x1a   :  { %3286 = vmatprep.subr.bf16.mxu1 %v4013_v21 }
  0x1d   :  { %3287 = vmatpush3.bf16.msra.mxu1 %v4013_v21 }
  0x1e   :  { %3288 = vmatprep.subr.bf16.mxu1 %v119_v24 }
  0x20   :  { %3271 = vmatmul.mubr.msk.bf16.gmra.mxu0 %vm167_vm2, %v3995_v17 }
  0x21   :  { %3274 = vmatprep.mubr.msk.bf16.mxu0 %vm167_vm2, %v4009_v20  ;;  %3289 = vmatpush3.bf16.msra.mxu1 %v119_v24 }
  0x24   :  { %3291 = vmatmul.mubr.msk.bf16.vlgmr.msra.gmra.mxu1 %vm336_vm3, %v4043_v27 }
  0x25   :  { %3294 = vmatprep.mubr.msk.bf16.mxu1 %vm336_vm3, %v4050_v28 }
  0x28   :  { %3275 = vmatmul.mubr.msk.bf16.gmra.mxu0 %vm167_vm2, %v4032_v25 }
  0x29   :  { %3278 = vmatprep.mubr.msk.bf16.mxu0 %vm167_vm2, %v4038_v26 }
  0x2c   :  { %3295 = vmatmul.mubr.msk.bf16.gmra.mxu1 %vm336_vm3, %v4066_v30 }
  0x2d   :  { %3298 = vmatprep.mubr.msk.bf16.mxu1 %vm336_vm3, %v4073_v31 }
  0x30   :  { %3279 = vmatmul.mubr.msk.bf16.gmra.mxu0 %vm167_vm2, %v4059_v29 }
  0x31   :  { %3322 = vmatprep.mubr.bf16.mxu0 %v4112_v22 }
  0x34   :  { %3299 = vmatmul.mubr.msk.bf16.gmra.mxu1 %vm336_vm3, %v4082_v32 }
  0x35   :  { %3302 = vmatprep.mubr.msk.bf16.mxu1 %vm336_vm3, %v4087_v33 }
  0x3c   :  { %3303 = vmatmul.mubr.msk.bf16.gmra.mxu1 %vm336_vm3, %v4096_v34 }
  0x3d   :  { %3334 = vmatprep.mubr.msk.bf16.mxu1 %vm522_vm4, %v119_v24  ;;  %v93_v24 = vld [vmem:[#allocation2 + $0x48] sm:$0xff] }
  0xd8   :  { %v3268_v35 = vpop.f32.mrf.mxu0 }
  0xd9   :  { %v242_v16 = vadd.f32 %v3268_v35, %v2933_v45 }
  0xda   :  { %v233_v36 = vpop.f32.mrf.mxu0 }
  0xdb   :  { %v234_v2 = vadd.f32 %v2933_v45, %v233_v36  ;;  %v90_v36 = vld [vmem:[#allocation2 + $0x30] sm:$0xff] }
  0xdc   :  { %v3269_v37 = vpop.f32.mrf.mxu0 }
  0xdd   :  { %v245_v12 = vadd.f32 %v3269_v37, %v2933_v45  ;;  %v91_v37 = vld [vmem:[#allocation2 + $0x38] sm:$0xff] }
  0xde   :  { %v236_v38 = vpop.f32.mrf.mxu0 }
  0xdf   :  { %v237_v62 = vadd.f32 %v2933_v45, %v236_v38  ;;  %v3721_v18 = vpack.i.bf16 %v245_v12, %v242_v16  ;;  %v4115_v38 = vpack.c.bf16 %v93_v24, %v92_v23 }
  0xe0   :  { %v3272_v39 = vpop.f32.mrf.mxu0 }
  0xe1   :  { %v3726_v5 = vpack.i.bf16 %v237_v62, %v234_v2  ;;  %v258_v11 = vadd.f32 %v3272_v39, %v2933_v45  ;;  %v4117_v39 = vpack.c.bf16 %v91_v37, %v90_v36  ;;  %3330 = vmatprep.subr.bf16.mxu1 %v4115_v38 }
  0xe2   :  { %v249_v40 = vpop.f32.mrf.mxu0  ;;  %3331 = vmatpush3.bf16.msra.mxu1 %v4115_v38 }
  0xe3   :  { %v250_v58 = vadd.f32 %v2933_v45, %v249_v40  ;;  %3332 = vmatprep.subr.bf16.mxu1 %v4117_v39 }
  0xe4   :  { %v3273_v41 = vpop.f32.mrf.mxu0  ;;  %v4129_v35 = vpop.f32.mrf.mxu1 }
  0xe5   :  { %v261_v7 = vadd.f32 %v3273_v41, %v2933_v45 }
  0xe6   :  { %v252_v42 = vpop.f32.mrf.mxu0  ;;  %3333 = vmatpush3.bf16.msra.mxu1 %v4117_v39  ;;  %v4131_v40 = vpop.f32.mrf.mxu1 }
  0xe7   :  { %v253_v55 = vadd.f32 %v2933_v45, %v252_v42  ;;  %v3711_v13 = vpack.i.bf16 %v261_v7, %v258_v11 }
  0xe8   :  { %v3276_v43 = vpop.f32.mrf.mxu0  ;;  %v4133_v41 = vpop.f32.mrf.mxu1 }
  0xe9   :  { %v274_v47 = vadd.f32 %v3276_v43, %v2933_v45  ;;  %v3716_v63 = vpack.i.bf16 %v253_v55, %v250_v58  ;;  %3335 = vmatmul.mubr.msk.bf16.vlgmr.msra.gmra.mxu1 %vm522_vm4, %v4013_v21 }
  0xea   :  { %v265_v44 = vpop.f32.mrf.mxu0  ;;  %3338 = vmatprep.mubr.msk.bf16.mxu1 %vm522_vm4, %v3987_v15  ;;  %v4135_v42 = vpop.f32.mrf.mxu1 }
  0xeb   :  { %v266_v53 = vadd.f32 %v2933_v45, %v265_v44 }
  0xec   :  { %v3277_v46 = vpop.f32.mrf.mxu0  ;;  %v3296_v43 = vpop.f32.mrf.mxu1 }
  0xed   :  { %v277_v48 = vadd.f32 %v3277_v46, %v2933_v45 }
  0xee   :  { %v268_v49 = vpop.f32.mrf.mxu0  ;;  %v411_v44 = vpop.f32.mrf.mxu1 }
  0xef   :  { %v269_v50 = vadd.f32 %v2933_v45, %v268_v49  ;;  %v3701_v51 = vpack.i.bf16 %v277_v48, %v274_v47 }
  0xf0   :  { %v3280_v52 = vpop.f32.mrf.mxu0 }
  0xf1   :  { %3702 = vrot.lane.b32.xlu1 %v3701_v51, %s3905_s25  ;;  %v3706_v56 = vpack.i.bf16 %v269_v50, %v266_v53  ;;  %v290_v59 = vadd.f32 %v3280_v52, %v2933_v45  ;;  %3339 = vmatmul.mubr.msk.bf16.gmra.mxu1 %vm522_vm4, %v3985_v14 }
  0xf2   :  { %v281_v54 = vpop.f32.mrf.mxu0 }
  0xf3   :  { %v282_v3 = vadd.f32 %v2933_v45, %v281_v54 }
  0xf4   :  { %v3281_v57 = vpop.f32.mrf.mxu0 }
  0xf5   :  { %v293_v60 = vadd.f32 %v3281_v57, %v2933_v45  ;;  %3707 = vrot.lane.b32.xlu1 %v3706_v56, %s3905_s25 }
  0xf6   :  { %v284_v61 = vpop.f32.mrf.mxu0 }
  0xf7   :  { %v285_v0 = vadd.f32 %v2933_v45, %v284_v61  ;;  %v3691_v1 = vpack.i.bf16 %v293_v60, %v290_v59  ;;  %v3297_v45 = vpop.f32.mrf.mxu1 }
  0xf9   :  { %3692 = vrot.lane.b32.xlu0 %v3691_v1, %s3905_s25  ;;  %3717 = vrot.lane.b32.xlu1 %v3716_v63, %s3905_s25  ;;  %v3696_v10 = vpack.i.bf16 %v285_v0, %v282_v3  ;;  %v414_v46 = vpop.f32.mrf.mxu1 }
  0xfb   :  { %v3300_v47 = vpop.f32.mrf.mxu1 }
  0xfd   :  { %3697 = vrot.lane.b32.xlu0 %v3696_v10, %s3905_s25  ;;  %3727 = vrot.lane.b32.xlu1 %v3726_v5, %s3905_s25  ;;  %v427_v21 = vpop.f32.mrf.mxu1 }
  0xff   :  { %v3301_v48 = vpop.f32.mrf.mxu1 }
 0x101   :  { %3712 = vrot.lane.b32.xlu0 %v3711_v13, %s3905_s25  ;;  %v430_v49 = vpop.f32.mrf.mxu1 }
 0x103   :  { %v3304_v15 = vpop.f32.mrf.mxu1 }
 0x105   :  { %3722 = vrot.lane.b32.xlu0 %v3721_v18, %s3905_s25  ;;  %v443_v51 = vpop.f32.mrf.mxu1 }
 0x107   :  { %v3305_v56 = vpop.f32.mrf.mxu1 }
 0x109   :  { %v446_v0 = vpop.f32.mrf.mxu1 }
 0x163   :  { %v3703_v50 = vpop.permute.xlu1 %3702 }
 0x164   :  { %v3705_v54 = vunpack.i.h.bf16 %v3703_v50  ;;  %v3704_v55 = vunpack.i.l.bf16 %v3703_v50 }
 0x166   :  { %v533_v1 = vsel %vm522_vm4, %v3300_v47, %v3704_v55  ;;  %v534_v2 = vsel %vm522_vm4, %v3301_v48, %v3705_v54 }
 0x167   :  { %v3708_v59 = vpop.permute.xlu1 %3707  ;;  %v544_v13 = vpack.c.bf16 %v534_v2, %v533_v1 }
 0x168   :  { %v3710_v3 = vunpack.i.h.bf16 %v3708_v59  ;;  %v3709_v5 = vunpack.i.l.bf16 %v3708_v59  ;;  %v96_v59 = vld [vmem:[#allocation2 + $0x60] sm:$0xff] }
 0x16a   :  { %v531_v23 = vsel %vm522_vm4, %v427_v21, %v3709_v5  ;;  %v532_v24 = vsel %vm522_vm4, %v430_v49, %v3710_v3 }
 0x16b   :  { %v3693_v14 = vpop.permute.xlu0 %3692  ;;  %v3718_v36 = vpop.permute.xlu1 %3717  ;;  %v543_v37 = vpack.c.bf16 %v532_v24, %v531_v23 }
 0x16c   :  { %v3695_v52 = vunpack.i.h.bf16 %v3693_v14  ;;  %v3694_v53 = vunpack.i.l.bf16 %v3693_v14  ;;  %v3720_v47 = vunpack.i.h.bf16 %v3718_v36  ;;  %v3719_v48 = vunpack.i.l.bf16 %v3718_v36 }
 0x16e   :  { %v537_v57 = vsel %vm522_vm4, %v3304_v15, %v3694_v53  ;;  %v538_v58 = vsel %vm522_vm4, %v3305_v56, %v3695_v52  ;;  %v527_v21 = vsel %vm522_vm4, %v411_v44, %v3719_v48  ;;  %v528_v49 = vsel %vm522_vm4, %v414_v46, %v3720_v47 }
 0x16f   :  { %v3698_v60 = vpop.permute.xlu0 %3697  ;;  %v546_v61 = vpack.c.bf16 %v538_v58, %v537_v57  ;;  %v3728_v54 = vpop.permute.xlu1 %3727  ;;  %v541_v55 = vpack.c.bf16 %v528_v49, %v527_v21  ;;  %v2978_v21 = vld [vmem:[#allocation2 + $0x1b0] ss:$0 sm:$0xff] }
 0x170   :  { %v3700_v62 = vunpack.i.h.bf16 %v3698_v60  ;;  %v3699_v63 = vunpack.i.l.bf16 %v3698_v60  ;;  %v3730_v56 = vunpack.i.h.bf16 %v3728_v54  ;;  %v3729_v57 = vunpack.i.l.bf16 %v3728_v54  ;;  %v97_v60 = vld [vmem:[#allocation2 + $0x68] sm:$0xff] }
 0x171   :  { %3306 = vmatprep.subr.bf16.mxu0 %v546_v61 }
 0x172   :  { %3307 = vmatpush3.bf16.msra.mxu0 %v546_v61  ;;  %v535_v7 = vsel %vm522_vm4, %v443_v51, %v3699_v63  ;;  %v536_v10 = vsel %vm522_vm4, %v446_v0, %v3700_v62  ;;  %v523_v44 = vsel %vm522_vm4, %v4131_v40, %v3729_v57  ;;  %v524_v46 = vsel %vm522_vm4, %v4135_v42, %v3730_v56  ;;  %v95_v63 = vld [vmem:[#allocation2 + $0x58] sm:$0xff]  ;;  %v4165_v40 = vld [vmem:[%s4690_s3 + $0x10] sm:$0xff]  }
 0x173   :  { %v3713_v11 = vpop.permute.xlu0 %3712  ;;  %v545_v12 = vpack.c.bf16 %v536_v10, %v535_v7  ;;  %v539_v61 = vpack.c.bf16 %v524_v46, %v523_v44  ;;  %v101_v62 = vpack.c.bf16 %v97_v60, %v96_v59  ;;  %v4172_v0 = vld [vmem:[%s4690_s3 + $0x18] sm:$0xff]  }
 0x174   :  { %v3715_v16 = vunpack.i.h.bf16 %v3713_v11  ;;  %v3714_v18 = vunpack.i.l.bf16 %v3713_v11 }
 0x175   :  { %3308 = vmatprep.subr.bf16.mxu0 %v545_v12 }
 0x176   :  { %3309 = vmatpush3.bf16.msra.mxu0 %v545_v12  ;;  %v529_v15 = vsel %vm522_vm4, %v3296_v43, %v3714_v18  ;;  %v530_v50 = vsel %vm522_vm4, %v3297_v45, %v3715_v16 }
 0x177   :  { %3310 = vmatprep.subr.bf16.mxu0 %v544_v13  ;;  %v3723_v51 = vpop.permute.xlu0 %3722  ;;  %v542_v14 = vpack.c.bf16 %v530_v50, %v529_v15 }
 0x178   :  { %v3725_v52 = vunpack.i.h.bf16 %v3723_v51  ;;  %v3724_v53 = vunpack.i.l.bf16 %v3723_v51 }
 0x17a   :  { %3311 = vmatpush3.bf16.msra.mxu0 %v544_v13  ;;  %v525_v43 = vsel %vm522_vm4, %v4129_v35, %v3724_v53  ;;  %v526_v45 = vsel %vm522_vm4, %v4133_v41, %v3725_v52  ;;  %v94_v35 = vld [vmem:[#allocation2 + $0x50] sm:$0xff]  ;;  %v4160_v41 = vld [vmem:[%s4690_s3 + $0x8] sm:$0xff]  }
 0x17b   :  { %3312 = vmatprep.subr.bf16.mxu0 %v543_v37  ;;  %v540_v58 = vpack.c.bf16 %v526_v45, %v525_v43  ;;  %v100_v42 = vpack.c.bf16 %v95_v63, %v94_v35 }
 0x17e   :  { %3313 = vmatpush3.bf16.msra.mxu0 %v543_v37 }
 0x17f   :  { %3314 = vmatprep.subr.bf16.mxu0 %v542_v14 }
 0x182   :  { %3315 = vmatpush3.bf16.msra.mxu0 %v542_v14  ;;  %v3906_v14 = vmov 0.0  }
 0x183   :  { %3316 = vmatprep.subr.bf16.mxu0 %v541_v55  ;;  %3358 = vmatprep.subr.mxu1 %v3906_v14 }
 0x184   :  { %3374 = vmatprep.mubr.msk.f32.mxu1 %vm3908_vm5, %v3906_v14 }
 0x186   :  { %3317 = vmatpush3.bf16.msra.mxu0 %v541_v55 }
 0x187   :  { %3318 = vmatprep.subr.bf16.mxu0 %v540_v58 }
 0x18a   :  { %3319 = vmatpush3.bf16.msra.mxu0 %v540_v58 }
 0x18b   :  { %3320 = vmatprep.subr.bf16.mxu0 %v539_v61 }
 0x18e   :  { %3321 = vmatpush3.bf16.msra.mxu0 %v539_v61 }
 0x18f   :  { %3342 = vmatprep.subr.bf16.mxu0 %v101_v62 }
 0x191   :  { %3323 = vmatmul.mubr.bf16.vlgmr.msra.gmra.mxu0 %v4160_v41 }
 0x192   :  { %3326 = vmatprep.mubr.bf16.mxu0 %v4165_v40  ;;  %3343 = vmatpush3.bf16.msra.mxu0 %v101_v62 }
 0x193   :  { %3344 = vmatprep.subr.bf16.mxu0 %v100_v42 }
 0x196   :  { %3345 = vmatpush3.bf16.msra.mxu0 %v100_v42 }
 0x197   :  { %3346 = vmatprep.subr.bf16.mxu0 %v4115_v38 }
 0x199   :  { %3327 = vmatmul.mubr.bf16.gmra.mxu0 %v4172_v0 }
 0x19a   :  { %3347 = vmatpush3.bf16.msra.mxu0 %v4115_v38 }
 0x19b   :  { %3348 = vmatprep.subr.bf16.mxu0 %v4117_v39 }
 0x19e   :  { %3349 = vmatpush3.bf16.msra.mxu0 %v4117_v39 }
 0x1a9   :  { %v3336_v39 = vpop.f32.mrf.mxu1 }
 0x1ab   :  { %v686_v23 = vpop.f32.mrf.mxu1 }
 0x1ad   :  { %v3337_v24 = vpop.f32.mrf.mxu1 }
 0x1af   :  { %v689_v36 = vpop.f32.mrf.mxu1 }
 0x1b1   :  { %v3340_v47 = vpop.f32.mrf.mxu1 }
 0x1b3   :  { %v702_v50 = vpop.f32.mrf.mxu1 }
 0x1b5   :  { %v3341_v49 = vpop.f32.mrf.mxu1 }
 0x1b7   :  { %v705_v46 = vpop.f32.mrf.mxu1 }
 0x251   :  { %v3324_v1 = vpop.f32.mrf.mxu0 }
 0x253   :  { %v605_v2 = vpop.f32.mrf.mxu0 }
 0x255   :  { %v3325_v3 = vpop.f32.mrf.mxu0 }
 0x256   :  { %v637_v10 = vpack.c.bf16 %v3325_v3, %v3324_v1 }
 0x257   :  { %v608_v5 = vpop.f32.mrf.mxu0 }
 0x258   :  { %v636_v7 = vpack.c.bf16 %v608_v5, %v605_v2 }
 0x259   :  { %v3328_v11 = vpop.f32.mrf.mxu0 }
 0x25a   :  { %3350 = vmatprep.mubr.msk.bf16.mxu0 %vm336_vm3, %v636_v7 }
 0x25b   :  { %v621_v12 = vpop.f32.mrf.mxu0  ;;  %3351 = vmatmul.mubr.msk.bf16.vlgmr.msra.gmra.mxu0 %vm336_vm3, %v637_v10 }
 0x25d   :  { %v3329_v13 = vpop.f32.mrf.mxu0 }
 0x25e   :  { %v639_v38 = vpack.c.bf16 %v3329_v13, %v3328_v11 }
 0x25f   :  { %v624_v16 = vpop.f32.mrf.mxu0 }
 0x260   :  { %v638_v18 = vpack.c.bf16 %v624_v16, %v621_v12 }
 0x262   :  { %3354 = vmatprep.mubr.msk.bf16.mxu0 %vm336_vm3, %v638_v18 }
 0x263   :  { %3355 = vmatmul.mubr.msk.bf16.gmra.mxu0 %vm336_vm3, %v639_v38 }
 0x31b   :  { %v3352_v37 = vpop.f32.mrf.mxu0 }
 0x31c   :  { %v772_v57 = vadd.f32 %v3352_v37, %v3336_v39 }
 0x31d   :  { %v763_v48 = vpop.f32.mrf.mxu0 }
 0x31e   :  { %v4193_v62 = vadd.f32 %v2978_v21, %v772_v57  ;;  %v764_v35 = vadd.f32 %v763_v48, %v686_v23 }
 0x31f   :  { %v3353_v15 = vpop.f32.mrf.mxu0 }
 0x320   :  { %v775_v63 = vadd.f32 %v3353_v15, %v3337_v24  ;;  %v4203_v3 = vadd.f32 %v2978_v21, %v764_v35  ;;  %v808_v11 = vmul.f32 %v4193_v62, %v4193_v62 }
 0x321   :  { %v766_v51 = vpop.f32.mrf.mxu0 }
 0x322   :  { %v4205_v5 = vadd.f32 %v2978_v21, %v775_v63  ;;  %v767_v7 = vadd.f32 %v766_v51, %v689_v36  ;;  %v806_v16 = vmul.f32 %v4203_v3, %v4203_v3  ;;  %v107_v63 = vld [vmem:[#allocation2 + $0x118] sm:$0xff] }
 0x323   :  { %v3356_v52 = vpop.f32.mrf.mxu0 }
 0x324   :  { %v788_v53 = vadd.f32 %v3356_v52, %v3340_v47  ;;  %v4215_v12 = vadd.f32 %v2978_v21, %v767_v7  ;;  %v809_v13 = vmul.f32 %v4205_v5, %v4205_v5 }
 0x325   :  { %v779_v54 = vpop.f32.mrf.mxu0 }
 0x326   :  { %v4184_v55 = vadd.f32 %v2978_v21, %v788_v53  ;;  %v780_v56 = vadd.f32 %v779_v54, %v702_v50  ;;  %v807_v18 = vmul.f32 %v4215_v12, %v4215_v12 }
 0x327   :  { %v3357_v43 = vpop.f32.mrf.mxu0 }
 0x328   :  { %v4186_v45 = vadd.f32 %v2978_v21, %v780_v56  ;;  %v791_v58 = vadd.f32 %v3357_v43, %v3341_v49  ;;  %v812_v44 = vmul.f32 %v4184_v55, %v4184_v55  ;;  %v3909_v56 = vmov 1.0  }
 0x329   :  { %v782_v59 = vpop.f32.mrf.mxu0 }
 0x32a   :  { %v4190_v60 = vadd.f32 %v2978_v21, %v791_v58  ;;  %v783_v61 = vadd.f32 %v782_v59, %v705_v46  ;;  %834 = vrot.lane.b32.xlu1 %v812_v44, %s3907_s0  ;;  %v810_v2 = vmul.f32 %v4186_v45, %v4186_v45  ;;  %v108_v46 = vld [vmem:[#allocation2 + $0x120] sm:$0xff]  ;;  %v109_v59 = vld [vmem:[#allocation2 + $0x128] sm:$0xff] }
 0x32b   :  { %v113_v35 = vpack.c.bf16 %v109_v59, %v108_v46 }
 0x32c   :  { %v4195_v42 = vadd.f32 %v2978_v21, %v783_v61  ;;  %v813_v1 = vmul.f32 %v4190_v60, %v4190_v60  ;;  %v106_v61 = vld [vmem:[#allocation2 + $0x110] sm:$0xff] }
 0x32d   :  { %3377 = vmatprep.subr.bf16.mxu0 %v113_v35 }
 0x32e   :  { %836 = vrot.lane.b32.xlu0 %v813_v1, %s3907_s0  ;;  %830 = vrot.lane.b32.xlu1 %v810_v2, %s3907_s0  ;;  %v811_v10 = vmul.f32 %v4195_v42, %v4195_v42  ;;  %v112_v1 = vpack.c.bf16 %v107_v63, %v106_v61 }
 0x32f   :  { %3378 = vmatpush3.bf16.msra.mxu0 %v113_v35 }
 0x330   :  { %3379 = vmatprep.subr.bf16.mxu0 %v112_v1 }
 0x332   :  { %832 = vrot.lane.b32.xlu0 %v811_v10, %s3907_s0  ;;  %826 = vrot.lane.b32.xlu1 %v808_v11, %s3907_s0  ;;  %v105_v11 = vld [vmem:[#allocation2 + $0x108] sm:$0xff] }
 0x333   :  { %3380 = vmatpush3.bf16.msra.mxu0 %v112_v1 }
 0x336   :  { %828 = vrot.lane.b32.xlu0 %v809_v13, %s3907_s0  ;;  %822 = vrot.lane.b32.xlu1 %v806_v16, %s3907_s0  ;;  %v934_v13 = vlaneseq }
 0x33a   :  { %824 = vrot.lane.b32.xlu0 %v807_v18, %s3907_s0  ;;  %v102_v18 = vld [vmem:[#allocation2 + $0xf0] sm:$0xff] }
 0x39c   :  { %v835_v38 = vpop.permute.xlu1 %834 }
 0x39d   :  { %v852_v36 = vsel %vm336_vm3, %v4184_v55, %v835_v38  ;;  %v103_v38 = vld [vmem:[#allocation2 + $0xf8] sm:$0xff] }
 0x3a0   :  { %v837_v39 = vpop.permute.xlu0 %836  ;;  %v831_v23 = vpop.permute.xlu1 %830 }
 0x3a1   :  { %v853_v24 = vsel %vm336_vm3, %v4190_v60, %v837_v39  ;;  %v850_v15 = vsel %vm336_vm3, %v4186_v45, %v831_v23  ;;  %v110_v39 = vpack.c.bf16 %v103_v38, %v102_v18  ;;  %v935_v23 = vshrl.u32 %v934_v13, 7 }
 0x3a2   :  { %3359 = vmatpush3.msra.mxu1 %v853_v24 }
 0x3a3   :  { %3360 = vmatprep.subr.mxu1 %v3906_v14  ;;  %v4254_v24 = vsub.s32 0, %v935_v23 }
 0x3a4   :  { %3361 = vmatpush3.msra.mxu1 %v852_v36  ;;  %v833_v37 = vpop.permute.xlu0 %832  ;;  %v827_v48 = vpop.permute.xlu1 %826 }
 0x3a5   :  { %v851_v47 = vsel %vm336_vm3, %v4195_v42, %v833_v37  ;;  %3362 = vmatprep.subr.mxu1 %v3906_v14  ;;  %v848_v52 = vsel %vm336_vm3, %v4193_v62, %v827_v48  ;;  %v1090_v48 = vld [vmem:[#allocation2 + $0x18] sm:$0x1] }
 0x3a6   :  { %3363 = vmatpush3.msra.mxu1 %v851_v47  ;;  %v1089_v47 = vld [vmem:[#allocation2 + $0x10] sm:$0xff] }
 0x3a7   :  { %3364 = vmatprep.subr.mxu1 %v3906_v14 }
 0x3a8   :  { %v829_v50 = vpop.permute.xlu0 %828  ;;  %3365 = vmatpush3.msra.mxu1 %v850_v15  ;;  %v823_v53 = vpop.permute.xlu1 %822  ;;  %v1091_v15 = vpack.c.bf16 %v1090_v48, %v1089_v47 }
 0x3a9   :  { %v849_v51 = vsel %vm336_vm3, %v4205_v5, %v829_v50  ;;  %3366 = vmatprep.subr.mxu1 %v3906_v14  ;;  %v846_v54 = vsel %vm336_vm3, %v4203_v3, %v823_v53 }
 0x3aa   :  { %3367 = vmatpush3.msra.mxu1 %v849_v51  ;;  %v1130_v50 = vand.u32 %v1091_v15, %v3949_v4 }
 0x3ab   :  { %3368 = vmatprep.subr.mxu1 %v3906_v14 }
 0x3ac   :  { %v825_v21 = vpop.permute.xlu0 %824  ;;  %3369 = vmatpush3.msra.mxu1 %v848_v52  ;;  %v2980_v52 = vld [vmem:[#allocation2 + $0x1b1] ss:$0 sm:$0xff] }
 0x3ad   :  { %v847_v49 = vsel %vm336_vm3, %v4215_v12, %v825_v21  ;;  %3370 = vmatprep.subr.mxu1 %v3906_v14 }
 0x3ae   :  { %3371 = vmatpush3.msra.mxu1 %v847_v49 }
 0x3af   :  { %3372 = vmatprep.subr.mxu1 %v3906_v14 }
 0x3b0   :  { %3373 = vmatpush3.msra.mxu1 %v846_v54 }
 0x3b1   :  { %3375 = vmatmul.mubr.msk.f32.vlgmr.msra.gmra.mxu1 %vm336_vm3, %v3909_v56  ;;  %3393 = vmatprep.subr.bf16.mxu1 %v1130_v50 }
 0x3b2   :  { %3395 = vmatprep.mubr.msk.bf16.mxu1 %vm167_vm2, %v3954_v6  ;;  %v104_v6 = vld [vmem:[#allocation2 + $0x100] sm:$0xff]  ;;  %3394 = vmatpush3.bf16.msra.mxu1 %v1130_v50 }
 0x3b3   :  { %v111_v16 = vpack.c.bf16 %v105_v11, %v104_v6 }
 0x3b5   :  { %3381 = vmatprep.subr.bf16.mxu0 %v111_v16  ;;  %3396 = vmatmul.mubr.msk.bf16.vlgmr.msra.gmra.mxu1 %vm167_vm2, %v3962_v8 }
 0x3b6   :  { %3382 = vmatpush3.bf16.msra.mxu0 %v111_v16  ;;  %3399 = vmatprep.mubr.msk.bf16.mxu1 %vm167_vm2, %v3967_v9 }
 0x3b7   :  { %3383 = vmatprep.subr.bf16.mxu0 %v110_v39 }
 0x3ba   :  { %3384 = vmatpush3.bf16.msra.mxu0 %v110_v39 }
 0x3bd   :  { %3400 = vmatmul.mubr.msk.bf16.gmra.mxu1 %vm167_vm2, %v3995_v17 }
 0x3be   :  { %3403 = vmatprep.mubr.msk.bf16.mxu1 %vm167_vm2, %v4009_v20 }
 0x3c5   :  { %3404 = vmatmul.mubr.msk.bf16.gmra.mxu1 %vm167_vm2, %v4032_v25 }
 0x3c6   :  { %3407 = vmatprep.mubr.msk.bf16.mxu1 %vm167_vm2, %v4038_v26 }
 0x3cd   :  { %3408 = vmatmul.mubr.msk.bf16.gmra.mxu1 %vm167_vm2, %v4059_v29 }
 0x3ce   :  { %3451 = vmatprep.mubr.bf16.mxu1 %v4112_v22 }
 0x471   :  { %v923_v57 = vpop.f32.mrf.mxu1 }
 0x472   :  { %v927_v43 = vmul.f32 0.015625, %v923_v57  ;;  %v2981_v57 = vld [vmem:[#allocation2 + $0x1b2] ss:$0 sm:$0xff] }
 0x473   :  { %v3376_v58 = vpop.f32.mrf.mxu1 }
 0x474   :  { %v928_v44 = vmul.f32 %v927_v43, %v927_v43  ;;  %v937_v8 = vrot.slane %v927_v43, %v4254_v24 }
 0x475   :  { %v3397_v50 = vpop.f32.mrf.mxu1 }
 0x476   :  { %930 = vrot.lane.b32.xlu0 %v928_v44, %s3907_s0  ;;  %v940_v9 = vsub.f32 %v4193_v62, %v937_v8  ;;  %v941_v17 = vsub.f32 %v4205_v5, %v937_v8  ;;  %v938_v51 = vsub.f32 %v4203_v3, %v937_v8  ;;  %v939_v20 = vsub.f32 %v4215_v12, %v937_v8 }
 0x477   :  { %v942_v53 = vsub.f32 %v4186_v45, %v937_v8  ;;  %v943_v26 = vsub.f32 %v4195_v42, %v937_v8  ;;  %v944_v29 = vsub.f32 %v4184_v55, %v937_v8  ;;  %v945_v22 = vsub.f32 %v4190_v60, %v937_v8  ;;  %v1166_v8 = vpop.f32.mrf.mxu1 }
 0x4e8   :  { %v931_v2 = vpop.permute.xlu0 %930 }
 0x4e9   :  { %v933_v7 = vsub.f32 %v927_v43, %v931_v2 }
 0x4eb   :  { %v946_v10 = vadd.f32 1e-05, %v933_v7 }
 0x4ed   :  { %3831 = vrsqrt.f32 %v946_v10 }
 0x4fa   :  { %v3832_v36 = vpop.eup %3831 }
 0x4fb   :  { %v951_v37 = vrot.slane %v3832_v36, %v4254_v24 }
 0x4fd   :  { %953 = vrot.lane.b32.xlu1 %v951_v37, %s3907_s0 }
 0x56f   :  { %v954_v25 = vpop.permute.xlu1 %953 }
 0x570   :  { %v958_v21 = vmul.f32 %v954_v25, %v940_v9  ;;  %v959_v49 = vmul.f32 %v954_v25, %v941_v17  ;;  %v956_v54 = vmul.f32 %v954_v25, %v938_v51  ;;  %v957_v62 = vmul.f32 %v954_v25, %v939_v20  ;;  %v3398_v9 = vpop.f32.mrf.mxu1 }
 0x571   :  { %v960_v5 = vmul.f32 %v954_v25, %v942_v53  ;;  %v961_v43 = vmul.f32 %v954_v25, %v943_v26  ;;  %v962_v3 = vmul.f32 %v954_v25, %v944_v29  ;;  %v963_v58 = vmul.f32 %v954_v25, %v945_v22 }
 0x572   :  { %v970_v12 = vmul.f32 %v2980_v52, %v958_v21  ;;  %v971_v44 = vmul.f32 %v2980_v52, %v959_v49  ;;  %v968_v46 = vmul.f32 %v2980_v52, %v956_v54  ;;  %v969_v59 = vmul.f32 %v2980_v52, %v957_v62  ;;  %v1169_v17 = vpop.f32.mrf.mxu1  ;;  %v2987_v21 = vld [vmem:[#allocation2 + $0x1bb] ss:$0 sm:$0xff] }
 0x573   :  { %v972_v45 = vmul.f32 %v2980_v52, %v960_v5  ;;  %v973_v61 = vmul.f32 %v2980_v52, %v961_v43  ;;  %v974_v2 = vmul.f32 %v2980_v52, %v962_v3  ;;  %v975_v7 = vmul.f32 %v2980_v52, %v963_v58 }
 0x574   :  { %v980_v42 = vadd.f32 %v2981_v57, %v968_v46  ;;  %v981_v35 = vadd.f32 %v2981_v57, %v969_v59  ;;  %v982_v55 = vadd.f32 %v2981_v57, %v970_v12  ;;  %v983_v63 = vadd.f32 %v2981_v57, %v971_v44  ;;  %v3401_v51 = vpop.f32.mrf.mxu1 }
 0x575   :  { %v984_v60 = vadd.f32 %v2981_v57, %v972_v45  ;;  %v985_v1 = vadd.f32 %v2981_v57, %v973_v61  ;;  %v986_v23 = vadd.f32 %v2981_v57, %v974_v2  ;;  %v987_v36 = vadd.f32 %v2981_v57, %v975_v7 }
 0x576   :  { %v988_v10 = vmax.f32 %v980_v42, 0.0  ;;  %v989_v6 = vmax.f32 %v981_v35, 0.0  ;;  %v990_v11 = vmax.f32 %v982_v55, 0.0  ;;  %v991_v13 = vmax.f32 %v983_v63, 0.0  ;;  %v1182_v20 = vpop.f32.mrf.mxu1 }
 0x577   :  { %v992_v16 = vmax.f32 %v984_v60, 0.0  ;;  %v993_v18 = vmax.f32 %v985_v1, 0.0  ;;  %v994_v47 = vmax.f32 %v986_v23, 0.0  ;;  %v995_v48 = vmax.f32 %v987_v36, 0.0 }
 0x578   :  { %v996_v38 = vpack.c.bf16 %v989_v6, %v988_v10  ;;  %v997_v39 = vpack.c.bf16 %v991_v13, %v990_v11  ;;  %v3402_v52 = vpop.f32.mrf.mxu1  ;;  %v1191_v45 = vadd.f32 %v3401_v51, %v2987_v21  ;;  %v1183_v55 = vadd.f32 %v2987_v21, %v1182_v20 }
 0x579   :  { %v998_v37 = vpack.c.bf16 %v993_v18, %v992_v16  ;;  %v999_v15 = vpack.c.bf16 %v995_v48, %v994_v47  ;;  %v1194_v61 = vadd.f32 %v3402_v52, %v2987_v21  ;;  %v1175_v1 = vadd.f32 %v3397_v50, %v2987_v21 }
 0x57a   :  { %3385 = vmatprep.mubr.msk.bf16.mxu0 %vm336_vm3, %v996_v38  ;;  %v1185_v25 = vpop.f32.mrf.mxu1  ;;  %v1178_v2 = vadd.f32 %v3398_v9, %v2987_v21  ;;  %v1167_v10 = vadd.f32 %v2987_v21, %v1166_v8  ;;  %v1170_v6 = vadd.f32 %v2987_v21, %v1169_v17 }
 0x57b   :  { %3386 = vmatmul.mubr.msk.bf16.vlgmr.msra.gmra.mxu0 %vm336_vm3, %v997_v39  ;;  %v1186_v63 = vadd.f32 %v2987_v21, %v1185_v25  ;;  %v3751_v7 = vpack.i.bf16 %v1194_v61, %v1191_v45 }
 0x57c   :  { %3389 = vmatprep.mubr.msk.bf16.mxu0 %vm336_vm3, %v998_v37  ;;  %v3405_v53 = vpop.f32.mrf.mxu1  ;;  %v3761_v13 = vpack.i.bf16 %v1178_v2, %v1175_v1  ;;  %v3766_v16 = vpack.i.bf16 %v1170_v6, %v1167_v10  ;;  %v2982_v37 = vld [vmem:[#allocation2 + $0x1b4] ss:$0 sm:$0xff] }
 0x57d   :  { %v1207_v5 = vadd.f32 %v3405_v53, %v2987_v21  ;;  %v3756_v11 = vpack.i.bf16 %v1186_v63, %v1183_v55 }
 0x57e   :  { %v1198_v26 = vpop.f32.mrf.mxu1 }
 0x57f   :  { %v1199_v12 = vadd.f32 %v2987_v21, %v1198_v26 }
 0x580   :  { %v3406_v29 = vpop.f32.mrf.mxu1 }
 0x581   :  { %v1210_v43 = vadd.f32 %v3406_v29, %v2987_v21 }
 0x582   :  { %v1201_v22 = vpop.f32.mrf.mxu1 }
 0x583   :  { %3390 = vmatmul.mubr.msk.bf16.gmra.mxu0 %vm336_vm3, %v999_v15  ;;  %v1202_v44 = vadd.f32 %v2987_v21, %v1201_v22  ;;  %v3741_v42 = vpack.i.bf16 %v1210_v43, %v1207_v5 }
 0x584   :  { %3419 = vmatprep.mubr.msk.bf16.mxu0 %vm336_vm3, %v4004_v19  ;;  %v3409_v49 = vpop.f32.mrf.mxu1 }
 0x585   :  { %v1223_v62 = vadd.f32 %v3409_v49, %v2987_v21  ;;  %v3746_v60 = vpack.i.bf16 %v1202_v44, %v1199_v12  ;;  %v1092_v44 = vld [vmem:[#allocation2 + $0x70] sm:$0xff] }
 0x586   :  { %v1214_v54 = vpop.f32.mrf.mxu1 }
 0x587   :  { %v1215_v19 = vadd.f32 %v2987_v21, %v1214_v54 }
 0x588   :  { %v3410_v57 = vpop.f32.mrf.mxu1 }
 0x589   :  { %v1226_v3 = vadd.f32 %v3410_v57, %v2987_v21 }
 0x58a   :  { %v1217_v58 = vpop.f32.mrf.mxu1 }
 0x58b   :  { %v3731_v46 = vpack.i.bf16 %v1226_v3, %v1223_v62  ;;  %v1218_v59 = vadd.f32 %v2987_v21, %v1217_v58  ;;  %v1095_v3 = vld [vmem:[#allocation2 + $0x88] sm:$0xff] }
 0x58d   :  { %v3736_v35 = vpack.i.bf16 %v1218_v59, %v1215_v19  ;;  %3732 = vrot.lane.b32.xlu0 %v3731_v46, %s3905_s25  ;;  %v1094_v19 = vld [vmem:[#allocation2 + $0x80] sm:$0xff]  ;;  %v1093_v46 = vld [vmem:[#allocation2 + $0x78] sm:$0xff] }
 0x58e   :  { %v4297_v12 = vpack.c.bf16 %v1095_v3, %v1094_v19  ;;  %v4300_v59 = vpack.c.bf16 %v1093_v46, %v1092_v44 }
 0x58f   :  { %3737 = vrot.lane.b32.xlu1 %v3736_v35, %s3905_s25 }
 0x591   :  { %3742 = vrot.lane.b32.xlu0 %v3741_v42, %s3905_s25 }
 0x593   :  { %3747 = vrot.lane.b32.xlu1 %v3746_v60, %s3905_s25 }
 0x595   :  { %3752 = vrot.lane.b32.xlu0 %v3751_v7, %s3905_s25 }
 0x597   :  { %3757 = vrot.lane.b32.xlu1 %v3756_v11, %s3905_s25 }
 0x599   :  { %3762 = vrot.lane.b32.xlu0 %v3761_v13, %s3905_s25 }
 0x59b   :  { %3767 = vrot.lane.b32.xlu1 %v3766_v16, %s3905_s25 }
 0x5ff   :  { %v3733_v63 = vpop.permute.xlu0 %3732 }
 0x600   :  { %v3734_v1 = vunpack.i.l.bf16 %v3733_v63  ;;  %v3735_v7 = vunpack.i.h.bf16 %v3733_v63  ;;  %v1098_v63 = vld [vmem:[#allocation2 + $0xa0] sm:$0xff] }
 0x601   :  { %v3738_v10 = vpop.permute.xlu1 %3737 }
 0x602   :  { %v3740_v11 = vunpack.i.h.bf16 %v3738_v10  ;;  %v3739_v13 = vunpack.i.l.bf16 %v3738_v10 }
 0x63b   :  { %v3387_v18 = vpop.f32.mrf.mxu0 }
 0x63c   :  { %v1059_v25 = vadd.f32 %v3387_v18, %v2982_v37 }
 0x63d   :  { %v1050_v38 = vpop.f32.mrf.mxu0 }
 0x63e   :  { %v1083_v54 = vmax.f32 %v1059_v25, 0.0  ;;  %v1051_v62 = vadd.f32 %v2982_v37, %v1050_v38  ;;  %v3743_v38 = vpop.permute.xlu0 %3742 }
 0x63f   :  { %v3388_v39 = vpop.f32.mrf.mxu0 }
 0x640   :  { %v1062_v17 = vadd.f32 %v3388_v39, %v2982_v37  ;;  %v1081_v43 = vmax.f32 %v1051_v62, 0.0 }
 0x641   :  { %v1053_v23 = vpop.f32.mrf.mxu0 }
 0x642   :  { %v1084_v22 = vmax.f32 %v1062_v17, 0.0  ;;  %v1054_v21 = vadd.f32 %v2982_v37, %v1053_v23  ;;  %v3753_v25 = vpop.permute.xlu0 %3752 }
 0x643   :  { %v3391_v36 = vpop.f32.mrf.mxu0 }
 0x644   :  { %v1075_v48 = vadd.f32 %v3391_v36, %v2982_v37  ;;  %v1122_v57 = vpack.c.bf16 %v1084_v22, %v1083_v54  ;;  %v1082_v5 = vmax.f32 %v1054_v21, 0.0  ;;  %v3745_v36 = vunpack.i.h.bf16 %v3743_v38 }
 0x645   :  { %v1066_v47 = vpop.f32.mrf.mxu0 }
 0x646   :  { %v1067_v50 = vadd.f32 %v2982_v37, %v1066_v47  ;;  %v1087_v51 = vmax.f32 %v1075_v48, 0.0  ;;  %v1121_v58 = vpack.c.bf16 %v1082_v5, %v1081_v43 }
 0x647   :  { %v3392_v15 = vpop.f32.mrf.mxu0 }
 0x648   :  { %v1078_v8 = vadd.f32 %v3392_v15, %v2982_v37  ;;  %v1085_v53 = vmax.f32 %v1067_v50, 0.0 }
 0x649   :  { %v1069_v9 = vpop.f32.mrf.mxu0 }
 0x64a   :  { %v1088_v20 = vmax.f32 %v1078_v8, 0.0  ;;  %v1070_v52 = vadd.f32 %v2982_v37, %v1069_v9  ;;  %v3744_v37 = vunpack.i.l.bf16 %v3743_v38  ;;  %v3748_v8 = vpop.permute.xlu1 %3747 }
 0x64b   :  { %v3750_v9 = vunpack.i.h.bf16 %v3748_v8 }
 0x64c   :  { %v1124_v26 = vpack.c.bf16 %v1088_v20, %v1087_v51  ;;  %v1086_v29 = vmax.f32 %v1070_v52, 0.0  ;;  %v3749_v20 = vunpack.i.l.bf16 %v3748_v8 }
 0x64e   :  { %v1123_v49 = vpack.c.bf16 %v1086_v29, %v1085_v53  ;;  %3411 = vmatprep.subr.bf16.mxu0 %v1124_v26  ;;  %v3755_v53 = vunpack.i.h.bf16 %v3753_v25 }
 0x64f   :  { %3412 = vmatpush3.bf16.msra.mxu0 %v1124_v26 }
 0x650   :  { %3413 = vmatprep.subr.bf16.mxu0 %v1123_v49 }
 0x653   :  { %3414 = vmatpush3.bf16.msra.mxu0 %v1123_v49 }
 0x654   :  { %3415 = vmatprep.subr.bf16.mxu0 %v1122_v57 }
 0x657   :  { %3416 = vmatpush3.bf16.msra.mxu0 %v1122_v57 }
 0x658   :  { %3417 = vmatprep.subr.bf16.mxu0 %v1121_v58 }
 0x65b   :  { %3418 = vmatpush3.bf16.msra.mxu0 %v1121_v58 }
 0x65c   :  { %3459 = vmatprep.subr.bf16.mxu0 %v4297_v12 }
 0x65e   :  { %3420 = vmatmul.mubr.msk.bf16.vlgmr.msra.gmra.mxu0 %vm336_vm3, %v4043_v27 }
 0x65f   :  { %3423 = vmatprep.mubr.msk.bf16.mxu0 %vm336_vm3, %v4050_v28  ;;  %3460 = vmatpush3.bf16.msra.mxu0 %v4297_v12 }
 0x660   :  { %3461 = vmatprep.subr.bf16.mxu0 %v4300_v59 }
 0x663   :  { %3462 = vmatpush3.bf16.msra.mxu0 %v4300_v59 }
 0x664   :  { %3487 = vmatprep.subr.mxu0 %v3906_v14 }
 0x666   :  { %3424 = vmatmul.mubr.msk.bf16.gmra.mxu0 %vm336_vm3, %v4066_v30 }
 0x667   :  { %3427 = vmatprep.mubr.msk.bf16.mxu0 %vm336_vm3, %v4073_v31 }
 0x66e   :  { %3428 = vmatmul.mubr.msk.bf16.gmra.mxu0 %vm336_vm3, %v4082_v32 }
 0x66f   :  { %3431 = vmatprep.mubr.msk.bf16.mxu0 %vm336_vm3, %v4087_v33 }
 0x676   :  { %3432 = vmatmul.mubr.msk.bf16.gmra.mxu0 %vm336_vm3, %v4096_v34 }
 0x677   :  { %3463 = vmatprep.mubr.msk.bf16.mxu0 %vm522_vm4, %v1121_v58 }
 0x67e   :  { %3464 = vmatmul.mubr.msk.bf16.vlgmr.msra.gmra.mxu0 %vm522_vm4, %v1122_v57  ;;  %v3763_v57 = vpop.permute.xlu0 %3762 }
 0x67f   :  { %3467 = vmatprep.mubr.msk.bf16.mxu0 %vm522_vm4, %v1123_v49  ;;  %v3758_v49 = vpop.permute.xlu1 %3757  ;;  %v3765_v3 = vunpack.i.h.bf16 %v3763_v57  ;;  %v3764_v58 = vunpack.i.l.bf16 %v3763_v57 }
 0x680   :  { %v3760_v54 = vunpack.i.h.bf16 %v3758_v49  ;;  %v3759_v43 = vunpack.i.l.bf16 %v3758_v49 }
 0x683   :  { %v3768_v46 = vpop.permute.xlu1 %3767 }
 0x686   :  { %3468 = vmatmul.mubr.msk.bf16.gmra.mxu0 %vm522_vm4, %v1124_v26  ;;  %v3754_v26 = vunpack.i.l.bf16 %v3753_v25 }
 0x687   :  { %3503 = vmatprep.mubr.msk.f32.mxu0 %vm3908_vm5, %v3906_v14 }
 0x71e   :  { %v4326_v27 = vpop.f32.mrf.mxu0 }
 0x720   :  { %v4328_v28 = vpop.f32.mrf.mxu0 }
 0x722   :  { %v4330_v30 = vpop.f32.mrf.mxu0 }
 0x724   :  { %v4332_v31 = vpop.f32.mrf.mxu0 }
 0x726   :  { %v3425_v32 = vpop.f32.mrf.mxu0 }
 0x727   :  { %v1396_v62 = vsel %vm522_vm4, %v3425_v32, %v3754_v26  ;;  %v1392_v32 = vsel %vm522_vm4, %v4326_v27, %v3764_v58 }
 0x728   :  { %v1279_v33 = vpop.f32.mrf.mxu0 }
 0x729   :  { %v1394_v44 = vsel %vm522_vm4, %v1279_v33, %v3759_v43 }
 0x72a   :  { %v3426_v34 = vpop.f32.mrf.mxu0 }
 0x72b   :  { %v1397_v21 = vsel %vm522_vm4, %v3426_v34, %v3755_v53  ;;  %v1393_v34 = vsel %vm522_vm4, %v4330_v30, %v3765_v3 }
 0x72c   :  { %v1282_v45 = vpop.f32.mrf.mxu0  ;;  %v1409_v5 = vpack.c.bf16 %v1397_v21, %v1396_v62 }
 0x72d   :  { %v1395_v19 = vsel %vm522_vm4, %v1282_v45, %v3760_v54 }
 0x72e   :  { %v3429_v61 = vpop.f32.mrf.mxu0 }
 0x72f   :  { %v1400_v17 = vsel %vm522_vm4, %v3429_v61, %v3744_v37  ;;  %v1408_v61 = vpack.c.bf16 %v1395_v19, %v1394_v44 }
 0x730   :  { %v1295_v42 = vpop.f32.mrf.mxu0 }
 0x731   :  { %v1398_v29 = vsel %vm522_vm4, %v1295_v42, %v3749_v20  ;;  %v3770_v42 = vunpack.i.h.bf16 %v3768_v46 }
 0x732   :  { %v3430_v35 = vpop.f32.mrf.mxu0 }
 0x733   :  { %v1401_v50 = vsel %vm522_vm4, %v3430_v35, %v3745_v36  ;;  %v1407_v35 = vpack.c.bf16 %v1393_v34, %v1392_v32  ;;  %v1391_v45 = vsel %vm522_vm4, %v4332_v31, %v3770_v42 }
 0x734   :  { %v1298_v55 = vpop.f32.mrf.mxu0  ;;  %v1411_v51 = vpack.c.bf16 %v1401_v50, %v1400_v17 }
 0x735   :  { %v1399_v52 = vsel %vm522_vm4, %v1298_v55, %v3750_v9  ;;  %v3769_v55 = vunpack.i.l.bf16 %v3768_v46 }
 0x736   :  { %v3433_v60 = vpop.f32.mrf.mxu0  ;;  %v1410_v22 = vpack.c.bf16 %v1399_v52, %v1398_v29 }
 0x737   :  { %v1404_v16 = vsel %vm522_vm4, %v3433_v60, %v3734_v1  ;;  %v1390_v33 = vsel %vm522_vm4, %v4328_v28, %v3769_v55  ;;  %v1099_v60 = vld [vmem:[#allocation2 + $0xa8] sm:$0xff] }
 0x738   :  { %v1311_v2 = vpop.f32.mrf.mxu0  ;;  %v1406_v1 = vpack.c.bf16 %v1391_v45, %v1390_v33  ;;  %v1103_v30 = vpack.c.bf16 %v1099_v60, %v1098_v63 }
 0x739   :  { %v1402_v47 = vsel %vm522_vm4, %v1311_v2, %v3739_v13  ;;  %v1096_v2 = vld [vmem:[#allocation2 + $0x90] sm:$0xff] }
 0x73a   :  { %v3434_v6 = vpop.f32.mrf.mxu0 }
 0x73b   :  { %v1405_v18 = vsel %vm522_vm4, %v3434_v6, %v3735_v7  ;;  %v1097_v7 = vld [vmem:[#allocation2 + $0x98] sm:$0xff] }
 0x73c   :  { %v1413_v39 = vpack.c.bf16 %v1405_v18, %v1404_v16  ;;  %v1314_v23 = vpop.f32.mrf.mxu0  ;;  %v1102_v27 = vpack.c.bf16 %v1097_v7, %v1096_v2 }
 0x73d   :  { %v1403_v48 = vsel %vm522_vm4, %v1314_v23, %v3740_v11 }
 0x73e   :  { %v1412_v15 = vpack.c.bf16 %v1403_v48, %v1402_v47  ;;  %3435 = vmatprep.subr.bf16.mxu1 %v1413_v39 }
 0x73f   :  { %3436 = vmatpush3.bf16.msra.mxu1 %v1413_v39 }
 0x740   :  { %3437 = vmatprep.subr.bf16.mxu1 %v1412_v15 }
 0x743   :  { %3438 = vmatpush3.bf16.msra.mxu1 %v1412_v15 }
 0x744   :  { %3439 = vmatprep.subr.bf16.mxu1 %v1411_v51 }
 0x747   :  { %3440 = vmatpush3.bf16.msra.mxu1 %v1411_v51  ;;  %v3012_v51 = vld [vmem:[#allocation2 + $0x1b8] ss:$0 sm:$0xff] }
 0x748   :  { %3441 = vmatprep.subr.bf16.mxu1 %v1410_v22 }
 0x74b   :  { %3442 = vmatpush3.bf16.msra.mxu1 %v1410_v22 }
 0x74c   :  { %3443 = vmatprep.subr.bf16.mxu1 %v1409_v5 }
 0x74f   :  { %3444 = vmatpush3.bf16.msra.mxu1 %v1409_v5 }
 0x750   :  { %3445 = vmatprep.subr.bf16.mxu1 %v1408_v61 }
 0x753   :  { %3446 = vmatpush3.bf16.msra.mxu1 %v1408_v61 }
 0x754   :  { %3447 = vmatprep.subr.bf16.mxu1 %v1407_v35 }
 0x757   :  { %3448 = vmatpush3.bf16.msra.mxu1 %v1407_v35 }
 0x758   :  { %3449 = vmatprep.subr.bf16.mxu1 %v1406_v1 }
 0x75b   :  { %3450 = vmatpush3.bf16.msra.mxu1 %v1406_v1 }
 0x75c   :  { %3471 = vmatprep.subr.bf16.mxu1 %v1103_v30 }
 0x75e   :  { %3452 = vmatmul.mubr.bf16.vlgmr.msra.gmra.mxu1 %v4160_v41 }
 0x75f   :  { %3455 = vmatprep.mubr.bf16.mxu1 %v4165_v40  ;;  %3472 = vmatpush3.bf16.msra.mxu1 %v1103_v30 }
 0x760   :  { %3473 = vmatprep.subr.bf16.mxu1 %v1102_v27 }
 0x763   :  { %3474 = vmatpush3.bf16.msra.mxu1 %v1102_v27 }
 0x764   :  { %3475 = vmatprep.subr.bf16.mxu1 %v4297_v12 }
 0x766   :  { %3456 = vmatmul.mubr.bf16.gmra.mxu1 %v4172_v0 }
 0x767   :  { %3476 = vmatpush3.bf16.msra.mxu1 %v4297_v12 }
 0x768   :  { %3477 = vmatprep.subr.bf16.mxu1 %v4300_v59 }
 0x76b   :  { %3478 = vmatpush3.bf16.msra.mxu1 %v4300_v59  ;;  %v3465_v59 = vpop.f32.mrf.mxu0 }
 0x76d   :  { %v1529_v38 = vpop.f32.mrf.mxu0 }
 0x76f   :  { %v3466_v39 = vpop.f32.mrf.mxu0 }
 0x771   :  { %v1532_v23 = vpop.f32.mrf.mxu0 }
 0x773   :  { %v3469_v37 = vpop.f32.mrf.mxu0 }
 0x775   :  { %v1545_v15 = vpop.f32.mrf.mxu0 }
 0x777   :  { %v3470_v17 = vpop.f32.mrf.mxu0 }
 0x779   :  { %v1548_v49 = vpop.f32.mrf.mxu0 }
 0x81e   :  { %v3453_v28 = vpop.f32.mrf.mxu1 }
 0x820   :  { %v1448_v31 = vpop.f32.mrf.mxu1 }
 0x822   :  { %v3454_v10 = vpop.f32.mrf.mxu1 }
 0x823   :  { %v1480_v11 = vpack.c.bf16 %v3454_v10, %v3453_v28 }
 0x824   :  { %v1451_v6 = vpop.f32.mrf.mxu1 }
 0x825   :  { %v1479_v41 = vpack.c.bf16 %v1451_v6, %v1448_v31 }
 0x826   :  { %v3457_v40 = vpop.f32.mrf.mxu1 }
 0x827   :  { %3479 = vmatprep.mubr.msk.bf16.mxu1 %vm336_vm3, %v1479_v41 }
 0x828   :  { %v1464_v13 = vpop.f32.mrf.mxu1  ;;  %3480 = vmatmul.mubr.msk.bf16.vlgmr.msra.gmra.mxu1 %vm336_vm3, %v1480_v11 }
 0x82a   :  { %v3458_v16 = vpop.f32.mrf.mxu1 }
 0x82b   :  { %v1482_v12 = vpack.c.bf16 %v3458_v16, %v3457_v40 }
 0x82c   :  { %v1467_v0 = vpop.f32.mrf.mxu1 }
 0x82d   :  { %v1481_v18 = vpack.c.bf16 %v1467_v0, %v1464_v13  ;;  %v3837_v0 = vld [vmem:[%s4688_s1] sm:$0xff]  }
 0x82f   :  { %3483 = vmatprep.mubr.msk.bf16.mxu1 %vm336_vm3, %v1481_v18 }
 0x830   :  { %3484 = vmatmul.mubr.msk.bf16.gmra.mxu1 %vm336_vm3, %v1482_v12 }
 0x8e8   :  { %v3481_v36 = vpop.f32.mrf.mxu1 }
 0x8e9   :  { %v1615_v53 = vadd.f32 %v3481_v36, %v3465_v59  ;;  %v1108_v36 = vld [vmem:[#allocation2 + $0x150] sm:$0xff] }
 0x8ea   :  { %v1606_v47 = vpop.f32.mrf.mxu1 }
 0x8eb   :  { %v4374_v5 = vadd.f32 %v3012_v51, %v1615_v53  ;;  %v1607_v43 = vadd.f32 %v1606_v47, %v1529_v38  ;;  %v1109_v47 = vld [vmem:[#allocation2 + $0x158] sm:$0xff] }
 0x8ec   :  { %v3482_v48 = vpop.f32.mrf.mxu1 }
 0x8ed   :  { %v1618_v19 = vadd.f32 %v3482_v48, %v3466_v39  ;;  %v4384_v46 = vadd.f32 %v3012_v51, %v1607_v43  ;;  %v1651_v32 = vmul.f32 %v4374_v5, %v4374_v5  ;;  %v1110_v39 = vld [vmem:[#allocation2 + $0x160] sm:$0xff]  ;;  %v1114_v48 = vpack.c.bf16 %v1109_v47, %v1108_v36  ;;  %v3838_v43 = vld [vmem:[%s4688_s1 + $0x8] sm:$0xff]  }
 0x8ee   :  { %v1609_v50 = vpop.f32.mrf.mxu1 }
 0x8ef   :  { %v4386_v61 = vadd.f32 %v3012_v51, %v1618_v19  ;;  %v1610_v34 = vadd.f32 %v1609_v50, %v1532_v23  ;;  %v1649_v45 = vmul.f32 %v4384_v46, %v4384_v46  ;;  %v1111_v23 = vld [vmem:[#allocation2 + $0x168] sm:$0xff]  ;;  %v3839_v19 = vld [vmem:[%s4688_s1 + $0x10] sm:$0xff]  }
 0x8f0   :  { %v3485_v8 = vpop.f32.mrf.mxu1 }
 0x8f1   :  { %v1631_v9 = vadd.f32 %v3485_v8, %v3469_v37  ;;  %v4394_v35 = vadd.f32 %v3012_v51, %v1610_v34  ;;  %v1652_v55 = vmul.f32 %v4386_v61, %v4386_v61  ;;  %v1115_v37 = vpack.c.bf16 %v1111_v23, %v1110_v39  ;;  %v3843_v34 = vld [vmem:[%s4688_s1 + $0x30] sm:$0xff]  }
 0x8f2   :  { %v1622_v20 = vpop.f32.mrf.mxu1 }
 0x8f3   :  { %v4365_v52 = vadd.f32 %v3012_v51, %v1631_v9  ;;  %v1623_v25 = vadd.f32 %v1622_v20, %v1545_v15  ;;  %v1650_v33 = vmul.f32 %v4394_v35, %v4394_v35  ;;  %3506 = vmatprep.subr.bf16.mxu1 %v1115_v37  ;;  %v1106_v9 = vld [vmem:[#allocation2 + $0x140] sm:$0xff]  ;;  %v1104_v20 = vld [vmem:[#allocation2 + $0x130] sm:$0xff] }
 0x8f4   :  { %v3486_v26 = vpop.f32.mrf.mxu1  ;;  %3507 = vmatpush3.bf16.msra.mxu1 %v1115_v37 }
 0x8f5   :  { %v4367_v29 = vadd.f32 %v3012_v51, %v1623_v25  ;;  %v1634_v22 = vadd.f32 %v3486_v26, %v3470_v17  ;;  %v1655_v21 = vmul.f32 %v4365_v52, %v4365_v52  ;;  %3508 = vmatprep.subr.bf16.mxu1 %v1114_v48  ;;  %v1107_v17 = vld [vmem:[#allocation2 + $0x148] sm:$0xff]  ;;  %v1105_v25 = vld [vmem:[#allocation2 + $0x138] sm:$0xff] }
 0x8f6   :  { %v1625_v54 = vpop.f32.mrf.mxu1  ;;  %v1112_v53 = vpack.c.bf16 %v1105_v25, %v1104_v20 }
 0x8f7   :  { %v4371_v62 = vadd.f32 %v3012_v51, %v1634_v22  ;;  %v1626_v57 = vadd.f32 %v1625_v54, %v1548_v49  ;;  %1677 = vrot.lane.b32.xlu1 %v1655_v21, %s3907_s0  ;;  %v1653_v44 = vmul.f32 %v4367_v29, %v4367_v29  ;;  %v1929_v21 = vld [vmem:[#allocation2 + $0x20] sm:$0xff]  ;;  %v1930_v49 = vld [vmem:[#allocation2 + $0x28] sm:$0x1] }
 0x8f8   :  { %3509 = vmatpush3.bf16.msra.mxu1 %v1114_v48  ;;  %v1931_v54 = vpack.c.bf16 %v1930_v49, %v1929_v21 }
 0x8f9   :  { %v4376_v3 = vadd.f32 %v3012_v51, %v1626_v57  ;;  %v1656_v58 = vmul.f32 %v4371_v62, %v4371_v62  ;;  %v1113_v51 = vpack.c.bf16 %v1107_v17, %v1106_v9 }
 0x8fa   :  { %v1970_v57 = vand.u32 %v1931_v54, %v3949_v4  ;;  %v3841_v4 = vld [vmem:[%s4688_s1 + $0x20] sm:$0xff]  }
 0x8fb   :  { %1679 = vrot.lane.b32.xlu0 %v1656_v58, %s3907_s0  ;;  %1673 = vrot.lane.b32.xlu1 %v1653_v44, %s3907_s0  ;;  %v1654_v42 = vmul.f32 %v4376_v3, %v4376_v3  ;;  %v3840_v58 = vld [vmem:[%s4688_s1 + $0x18] sm:$0xff]   ;;  %v3842_v44 = vld [vmem:[%s4688_s1 + $0x28] sm:$0xff]  }
 0x8fc   :  { %3510 = vmatprep.subr.bf16.mxu1 %v1113_v51 }
 0x8fd   :  { %3511 = vmatpush3.bf16.msra.mxu1 %v1113_v51 }
 0x8fe   :  { %3512 = vmatprep.subr.bf16.mxu1 %v1112_v53 }
 0x8ff   :  { %1675 = vrot.lane.b32.xlu0 %v1654_v42, %s3907_s0  ;;  %1669 = vrot.lane.b32.xlu1 %v1651_v32, %s3907_s0  ;;  %v3844_v42 = vld [vmem:[%s4688_s1 + $0x38] sm:$0xff]   ;;  %v3845_v32 = vld [vmem:[%s4690_s3] sm:$0xff]  }
 0x901   :  { %3513 = vmatpush3.bf16.msra.mxu1 %v1112_v53 }
 0x903   :  { %1671 = vrot.lane.b32.xlu0 %v1652_v55, %s3907_s0  ;;  %1665 = vrot.lane.b32.xlu1 %v1649_v45, %s3907_s0 }
 0x907   :  { %1667 = vrot.lane.b32.xlu0 %v1650_v33, %s3907_s0 }
 0x969   :  { %v1678_v63 = vpop.permute.xlu1 %1677 }
 0x96a   :  { %v1695_v2 = vsel %vm336_vm3, %v4365_v52, %v1678_v63 }
 0x96d   :  { %v1680_v60 = vpop.permute.xlu0 %1679  ;;  %v1674_v1 = vpop.permute.xlu1 %1673 }
 0x96e   :  { %v1696_v30 = vsel %vm336_vm3, %v4371_v62, %v1680_v60  ;;  %v1693_v31 = vsel %vm336_vm3, %v4367_v29, %v1674_v1  ;;  %v3014_v1 = vld [vmem:[#allocation2 + $0x1b9] ss:$0 sm:$0xff] }
 0x96f   :  { %3488 = vmatpush3.msra.mxu0 %v1696_v30 }
 0x970   :  { %3489 = vmatprep.subr.mxu0 %v3906_v14 }
 0x971   :  { %3490 = vmatpush3.msra.mxu0 %v1695_v2  ;;  %v1676_v7 = vpop.permute.xlu0 %1675  ;;  %v1670_v28 = vpop.permute.xlu1 %1669 }
 0x972   :  { %v1694_v27 = vsel %vm336_vm3, %v4376_v3, %v1676_v7  ;;  %3491 = vmatprep.subr.mxu0 %v3906_v14  ;;  %v1691_v41 = vsel %vm336_vm3, %v4374_v5, %v1670_v28 }
 0x973   :  { %3492 = vmatpush3.msra.mxu0 %v1694_v27 }
 0x974   :  { %3493 = vmatprep.subr.mxu0 %v3906_v14 }
 0x975   :  { %v1672_v10 = vpop.permute.xlu0 %1671  ;;  %3494 = vmatpush3.msra.mxu0 %v1693_v31  ;;  %v1666_v11 = vpop.permute.xlu1 %1665 }
 0x976   :  { %v1692_v6 = vsel %vm336_vm3, %v4386_v61, %v1672_v10  ;;  %3495 = vmatprep.subr.mxu0 %v3906_v14  ;;  %v1689_v16 = vsel %vm336_vm3, %v4384_v46, %v1666_v11 }
 0x977   :  { %3496 = vmatpush3.msra.mxu0 %v1692_v6 }
 0x978   :  { %3497 = vmatprep.subr.mxu0 %v3906_v14 }
 0x979   :  { %v1668_v40 = vpop.permute.xlu0 %1667  ;;  %3498 = vmatpush3.msra.mxu0 %v1691_v41  ;;  %v3015_v41 = vld [vmem:[#allocation2 + $0x1ba] ss:$0 sm:$0xff] }
 0x97a   :  { %v1690_v13 = vsel %vm336_vm3, %v4394_v35, %v1668_v40  ;;  %3499 = vmatprep.subr.mxu0 %v3906_v14 }
 0x97b   :  { %3500 = vmatpush3.msra.mxu0 %v1690_v13 }
 0x97c   :  { %3501 = vmatprep.subr.mxu0 %v3906_v14 }
 0x97d   :  { %3502 = vmatpush3.msra.mxu0 %v1689_v16 }
 0x97e   :  { %3504 = vmatmul.mubr.msk.f32.vlgmr.msra.gmra.mxu0 %vm336_vm3, %v3909_v56  ;;  %3522 = vmatprep.subr.bf16.mxu0 %v1970_v57 }
 0x97f   :  { %3524 = vmatprep.mubr.msk.bf16.mxu0 %vm167_vm2, %v3837_v0  ;;  %3523 = vmatpush3.bf16.msra.mxu0 %v1970_v57 }
 0x982   :  { %3525 = vmatmul.mubr.msk.bf16.vlgmr.msra.gmra.mxu0 %vm167_vm2, %v3838_v43 }
 0x983   :  { %3528 = vmatprep.mubr.msk.bf16.mxu0 %vm167_vm2, %v3839_v19 }
 0x98a   :  { %3529 = vmatmul.mubr.msk.bf16.gmra.mxu0 %vm167_vm2, %v3840_v58 }
 0x98b   :  { %3532 = vmatprep.mubr.msk.bf16.mxu0 %vm167_vm2, %v3841_v4 }
 0x992   :  { %3533 = vmatmul.mubr.msk.bf16.gmra.mxu0 %vm167_vm2, %v3842_v44 }
 0x993   :  { %3536 = vmatprep.mubr.msk.bf16.mxu0 %vm167_vm2, %v3843_v34 }
 0x99a   :  { %3537 = vmatmul.mubr.msk.bf16.gmra.mxu0 %vm167_vm2, %v3844_v42 }
 0x99b   :  { %3580 = vmatprep.mubr.bf16.mxu0 %v3845_v32 }
 0xa3e   :  { %v1763_v18 = vpop.f32.mrf.mxu0 }
 0xa3f   :  { %v1767_v12 = vmul.f32 0.015625, %v1763_v18 }
 0xa40   :  { %v3505_v59 = vpop.f32.mrf.mxu0 }
 0xa41   :  { %v1768_v38 = vmul.f32 %v1767_v12, %v1767_v12  ;;  %v1777_v55 = vrot.slane %v1767_v12, %v4254_v24 }
 0xa42   :  { %v3526_v21 = vpop.f32.mrf.mxu0 }
 0xa43   :  { %1770 = vrot.lane.b32.xlu0 %v1768_v38, %s3907_s0  ;;  %v1780_v45 = vsub.f32 %v4374_v5, %v1777_v55  ;;  %v1781_v33 = vsub.f32 %v4386_v61, %v1777_v55  ;;  %v1778_v63 = vsub.f32 %v4384_v46, %v1777_v55  ;;  %v1779_v60 = vsub.f32 %v4394_v35, %v1777_v55 }
 0xa44   :  { %v1782_v2 = vsub.f32 %v4367_v29, %v1777_v55  ;;  %v1783_v7 = vsub.f32 %v4376_v3, %v1777_v55  ;;  %v1784_v27 = vsub.f32 %v4365_v52, %v1777_v55  ;;  %v1785_v28 = vsub.f32 %v4371_v62, %v1777_v55  ;;  %v2006_v49 = vpop.f32.mrf.mxu0  ;;  %v3021_v55 = vld [vmem:[#allocation2 + $0x1c3] ss:$0 sm:$0xff] }
 0xa46   :  { %v3527_v54 = vpop.f32.mrf.mxu0 }
 0xa48   :  { %v2009_v57 = vpop.f32.mrf.mxu0 }
 0xa4a   :  { %v3530_v43 = vpop.f32.mrf.mxu0 }
 0xa4c   :  { %v2022_v19 = vpop.f32.mrf.mxu0 }
 0xa4e   :  { %v3531_v58 = vpop.f32.mrf.mxu0 }
 0xa50   :  { %v2025_v4 = vpop.f32.mrf.mxu0 }
 0xa52   :  { %v3534_v44 = vpop.f32.mrf.mxu0 }
 0xa54   :  { %v2038_v34 = vpop.f32.mrf.mxu0 }
 0xa56   :  { %v3535_v42 = vpop.f32.mrf.mxu0 }
 0xa58   :  { %v2041_v32 = vpop.f32.mrf.mxu0 }
 0xab5   :  { %v1771_v15 = vpop.permute.xlu0 %1770 }
 0xab6   :  { %v1773_v50 = vsub.f32 %v1767_v12, %v1771_v15 }
 0xab8   :  { %v1786_v8 = vadd.f32 1e-05, %v1773_v50 }
 0xaba   :  { %3833 = vrsqrt.f32 %v1786_v8 }
 0xac7   :  { %v3834_v26 = vpop.eup %3833 }
 0xac8   :  { %v1791_v22 = vrot.slane %v3834_v26, %v4254_v24 }
 0xaca   :  { %1793 = vrot.lane.b32.xlu1 %v1791_v22, %s3907_s0  ;;  %v3846_v22 = vld [vmem:[%s4689_s2] sm:$0xff]  }
 0xb3c   :  { %v1794_v30 = vpop.permute.xlu1 %1793 }
 0xb3d   :  { %v1798_v31 = vmul.f32 %v1794_v30, %v1780_v45  ;;  %v1799_v10 = vmul.f32 %v1794_v30, %v1781_v33  ;;  %v1796_v6 = vmul.f32 %v1794_v30, %v1778_v63  ;;  %v1797_v5 = vmul.f32 %v1794_v30, %v1779_v60  ;;  %v3538_v45 = vpop.f32.mrf.mxu0 }
 0xb3e   :  { %v1800_v61 = vmul.f32 %v1794_v30, %v1782_v2  ;;  %v1801_v11 = vmul.f32 %v1794_v30, %v1783_v7  ;;  %v1802_v46 = vmul.f32 %v1794_v30, %v1784_v27  ;;  %v1803_v40 = vmul.f32 %v1794_v30, %v1785_v28 }
 0xb3f   :  { %v1810_v35 = vmul.f32 %v3014_v1, %v1798_v31  ;;  %v1811_v13 = vmul.f32 %v3014_v1, %v1799_v10  ;;  %v1808_v16 = vmul.f32 %v3014_v1, %v1796_v6  ;;  %v1809_v0 = vmul.f32 %v3014_v1, %v1797_v5  ;;  %v2054_v33 = vpop.f32.mrf.mxu0 }
 0xb40   :  { %v1812_v29 = vmul.f32 %v3014_v1, %v1800_v61  ;;  %v1813_v18 = vmul.f32 %v3014_v1, %v1801_v11  ;;  %v1814_v39 = vmul.f32 %v3014_v1, %v1802_v46  ;;  %v1815_v23 = vmul.f32 %v3014_v1, %v1803_v40 }
 0xb41   :  { %v1820_v3 = vadd.f32 %v3015_v41, %v1808_v16  ;;  %v1821_v12 = vadd.f32 %v3015_v41, %v1809_v0  ;;  %v1822_v52 = vadd.f32 %v3015_v41, %v1810_v35  ;;  %v1823_v59 = vadd.f32 %v3015_v41, %v1811_v13  ;;  %v3539_v60 = vpop.f32.mrf.mxu0 }
 0xb42   :  { %v1824_v62 = vadd.f32 %v3015_v41, %v1812_v29  ;;  %v1825_v38 = vadd.f32 %v3015_v41, %v1813_v18  ;;  %v1826_v17 = vadd.f32 %v3015_v41, %v1814_v39  ;;  %v1827_v51 = vadd.f32 %v3015_v41, %v1815_v23 }
 0xb43   :  { %v1828_v36 = vmax.f32 %v1820_v3, 0.0  ;;  %v1829_v37 = vmax.f32 %v1821_v12, 0.0  ;;  %v1830_v47 = vmax.f32 %v1822_v52, 0.0  ;;  %v1831_v48 = vmax.f32 %v1823_v59, 0.0  ;;  %v2057_v27 = vpop.f32.mrf.mxu0 }
 0xb44   :  { %v1832_v15 = vmax.f32 %v1824_v62, 0.0  ;;  %v1833_v50 = vmax.f32 %v1825_v38, 0.0  ;;  %v1834_v25 = vmax.f32 %v1826_v17, 0.0  ;;  %v1835_v53 = vmax.f32 %v1827_v51, 0.0 }
 0xb45   :  { %v1836_v8 = vpack.c.bf16 %v1829_v37, %v1828_v36  ;;  %v1837_v9 = vpack.c.bf16 %v1831_v48, %v1830_v47  ;;  %v2063_v63 = vadd.f32 %v3538_v45, %v3021_v55  ;;  %v2047_v1 = vadd.f32 %v3534_v44, %v3021_v55  ;;  %v3016_v36 = vld [vmem:[#allocation2 + $0x1bc] ss:$0 sm:$0xff]  ;;  %v1934_v44 = vld [vmem:[#allocation2 + $0xc0] sm:$0xff] }
 0xb46   :  { %v1838_v20 = vpack.c.bf16 %v1833_v50, %v1832_v15  ;;  %v1839_v26 = vpack.c.bf16 %v1835_v53, %v1834_v25  ;;  %v2050_v30 = vadd.f32 %v3535_v42, %v3021_v55  ;;  %v2055_v2 = vadd.f32 %v3021_v55, %v2054_v33  ;;  %v1933_v45 = vld [vmem:[#allocation2 + $0xb8] sm:$0xff] }
 0xb47   :  { %3514 = vmatprep.mubr.msk.bf16.mxu1 %vm336_vm3, %v1836_v8  ;;  %v2066_v7 = vadd.f32 %v3539_v60, %v3021_v55  ;;  %v2039_v28 = vadd.f32 %v3021_v55, %v2038_v34  ;;  %v2042_v31 = vadd.f32 %v3021_v55, %v2041_v32  ;;  %v2058_v6 = vadd.f32 %v3021_v55, %v2057_v27  ;;  %v1935_v34 = vld [vmem:[#allocation2 + $0xc8] sm:$0xff]  ;;  %v3848_v60 = vld [vmem:[%s4689_s2 + $0x10] sm:$0xff]   ;;  %v3853_v27 = vld [vmem:[%s4689_s2 + $0x38] sm:$0xff]  }
 0xb48   :  { %3515 = vmatmul.mubr.msk.bf16.vlgmr.msra.gmra.mxu1 %vm336_vm3, %v1837_v9  ;;  %v2031_v5 = vadd.f32 %v3530_v43, %v3021_v55  ;;  %v2034_v41 = vadd.f32 %v3531_v58, %v3021_v55  ;;  %v3781_v61 = vpack.i.bf16 %v2050_v30, %v2047_v1  ;;  %v2023_v46 = vadd.f32 %v3021_v55, %v2022_v19  ;;  %v3849_v1 = vld [vmem:[%s4689_s2 + $0x18] sm:$0xff]   ;;  %v3850_v30 = vld [vmem:[%s4689_s2 + $0x20] sm:$0xff]  }
 0xb49   :  { %3518 = vmatprep.mubr.msk.bf16.mxu1 %vm336_vm3, %v1838_v20  ;;  %v3771_v10 = vpack.i.bf16 %v2066_v7, %v2063_v63  ;;  %v3776_v11 = vpack.i.bf16 %v2058_v6, %v2055_v2  ;;  %v2026_v40 = vadd.f32 %v3021_v55, %v2025_v4  ;;  %v3786_v35 = vpack.i.bf16 %v2042_v31, %v2039_v28  ;;  %v3847_v63 = vld [vmem:[%s4689_s2 + $0x8] sm:$0xff]   ;;  %v3852_v7 = vld [vmem:[%s4689_s2 + $0x30] sm:$0xff]  }
 0xb4a   :  { %v2015_v13 = vadd.f32 %v3526_v21, %v3021_v55  ;;  %v2018_v16 = vadd.f32 %v3527_v54, %v3021_v55  ;;  %v3791_v0 = vpack.i.bf16 %v2034_v41, %v2031_v5  ;;  %v2007_v29 = vadd.f32 %v3021_v55, %v2006_v49  ;;  %v3851_v2 = vld [vmem:[%s4689_s2 + $0x28] sm:$0xff]  }
 0xb4b   :  { %3772 = vrot.lane.b32.xlu0 %v3771_v10, %s3905_s25  ;;  %3777 = vrot.lane.b32.xlu1 %v3776_v11, %s3905_s25  ;;  %v2010_v18 = vadd.f32 %v3021_v55, %v2009_v57  ;;  %v3796_v3 = vpack.i.bf16 %v2026_v40, %v2023_v46  ;;  %v4494_v32 = vpack.c.bf16 %v1935_v34, %v1934_v44  ;;  %v1932_v55 = vld [vmem:[#allocation2 + $0xb0] sm:$0xff] }
 0xb4c   :  { %v3801_v12 = vpack.i.bf16 %v2018_v16, %v2015_v13  ;;  %v4497_v33 = vpack.c.bf16 %v1933_v45, %v1932_v55 }
 0xb4d   :  { %v3806_v52 = vpack.i.bf16 %v2010_v18, %v2007_v29 }
 0xb4f   :  { %3782 = vrot.lane.b32.xlu0 %v3781_v61, %s3905_s25  ;;  %3787 = vrot.lane.b32.xlu1 %v3786_v35, %s3905_s25 }
 0xb50   :  { %3519 = vmatmul.mubr.msk.bf16.gmra.mxu1 %vm336_vm3, %v1839_v26 }
 0xb51   :  { %3548 = vmatprep.mubr.msk.bf16.mxu1 %vm336_vm3, %v3846_v22 }
 0xb53   :  { %3792 = vrot.lane.b32.xlu0 %v3791_v0, %s3905_s25  ;;  %3797 = vrot.lane.b32.xlu1 %v3796_v3, %s3905_s25 }
 0xb57   :  { %3802 = vrot.lane.b32.xlu0 %v3801_v12, %s3905_s25  ;;  %3807 = vrot.lane.b32.xlu1 %v3806_v52, %s3905_s25 }
 0xbbd   :  { %v3773_v16 = vpop.permute.xlu0 %3772  ;;  %v3778_v12 = vpop.permute.xlu1 %3777 }
 0xbbe   :  { %v3774_v29 = vunpack.i.l.bf16 %v3773_v16  ;;  %v3775_v3 = vunpack.i.h.bf16 %v3773_v16  ;;  %v1937_v16 = vld [vmem:[#allocation2 + $0xd8] sm:$0xff] }
 0xc08   :  { %v3516_v59 = vpop.f32.mrf.mxu1 }
 0xc09   :  { %v1899_v25 = vadd.f32 %v3516_v59, %v3016_v36  ;;  %v3780_v59 = vunpack.i.h.bf16 %v3778_v12 }
 0xc0a   :  { %v1890_v62 = vpop.f32.mrf.mxu1 }
 0xc0b   :  { %v1923_v57 = vmax.f32 %v1899_v25, 0.0  ;;  %v1891_v43 = vadd.f32 %v3016_v36, %v1890_v62  ;;  %v3779_v62 = vunpack.i.l.bf16 %v3778_v12 }
 0xc0c   :  { %v3517_v38 = vpop.f32.mrf.mxu1 }
 0xc0d   :  { %v1902_v9 = vadd.f32 %v3517_v38, %v3016_v36  ;;  %v1921_v4 = vmax.f32 %v1891_v43, 0.0 }
 0xc0e   :  { %v1893_v39 = vpop.f32.mrf.mxu1 }
 0xc0f   :  { %v1924_v21 = vmax.f32 %v1902_v9, 0.0  ;;  %v1894_v49 = vadd.f32 %v3016_v36, %v1893_v39 }
 0xc10   :  { %v3520_v23 = vpop.f32.mrf.mxu1 }
 0xc11   :  { %v1915_v47 = vadd.f32 %v3520_v23, %v3016_v36  ;;  %v1962_v19 = vpack.c.bf16 %v1924_v21, %v1923_v57  ;;  %v1922_v58 = vmax.f32 %v1894_v49, 0.0  ;;  %v3783_v23 = vpop.permute.xlu0 %3782 }
 0xc12   :  { %v1906_v37 = vpop.f32.mrf.mxu1 }
 0xc13   :  { %v1907_v15 = vadd.f32 %v3016_v36, %v1906_v37  ;;  %v1927_v17 = vmax.f32 %v1915_v47, 0.0  ;;  %v1961_v42 = vpack.c.bf16 %v1922_v58, %v1921_v4  ;;  %v3785_v47 = vunpack.i.h.bf16 %v3783_v23 }
 0xc14   :  { %v3521_v48 = vpop.f32.mrf.mxu1 }
 0xc15   :  { %v1918_v50 = vadd.f32 %v3521_v48, %v3016_v36  ;;  %v1925_v53 = vmax.f32 %v1907_v15, 0.0  ;;  %v3784_v48 = vunpack.i.l.bf16 %v3783_v23 }
 0xc16   :  { %v1909_v8 = vpop.f32.mrf.mxu1 }
 0xc17   :  { %v1928_v51 = vmax.f32 %v1918_v50, 0.0  ;;  %v1910_v20 = vadd.f32 %v3016_v36, %v1909_v8 }
 0xc19   :  { %v1964_v26 = vpack.c.bf16 %v1928_v51, %v1927_v17  ;;  %v1926_v22 = vmax.f32 %v1910_v20, 0.0  ;;  %v3788_v17 = vpop.permute.xlu1 %3787 }
 0xc1a   :  { %v3790_v51 = vunpack.i.h.bf16 %v3788_v17 }
 0xc1b   :  { %v1963_v54 = vpack.c.bf16 %v1926_v22, %v1925_v53  ;;  %3540 = vmatprep.subr.bf16.mxu1 %v1964_v26  ;;  %v3789_v53 = vunpack.i.l.bf16 %v3788_v17  ;;  %v3793_v22 = vpop.permute.xlu0 %3792 }
 0xc1c   :  { %3541 = vmatpush3.bf16.msra.mxu1 %v1964_v26  ;;  %v3795_v21 = vunpack.i.h.bf16 %v3793_v22  ;;  %v3794_v49 = vunpack.i.l.bf16 %v3793_v22 }
 0xc1d   :  { %3542 = vmatprep.subr.bf16.mxu1 %v1963_v54 }
 0xc1f   :  { %v3803_v44 = vpop.permute.xlu0 %3802 }
 0xc20   :  { %3543 = vmatpush3.bf16.msra.mxu1 %v1963_v54  ;;  %v3805_v45 = vunpack.i.h.bf16 %v3803_v44 }
 0xc21   :  { %3544 = vmatprep.subr.bf16.mxu1 %v1962_v19 }
 0xc24   :  { %3545 = vmatpush3.bf16.msra.mxu1 %v1962_v19 }
 0xc25   :  { %3546 = vmatprep.subr.bf16.mxu1 %v1961_v42 }
 0xc28   :  { %3547 = vmatpush3.bf16.msra.mxu1 %v1961_v42 }
 0xc29   :  { %3588 = vmatprep.subr.bf16.mxu1 %v4494_v32 }
 0xc2b   :  { %3549 = vmatmul.mubr.msk.bf16.vlgmr.msra.gmra.mxu1 %vm336_vm3, %v3847_v63  ;;  %v3804_v63 = vunpack.i.l.bf16 %v3803_v44 }
 0xc2c   :  { %3552 = vmatprep.mubr.msk.bf16.mxu1 %vm336_vm3, %v3848_v60  ;;  %3589 = vmatpush3.bf16.msra.mxu1 %v4494_v32 }
 0xc2d   :  { %3590 = vmatprep.subr.bf16.mxu1 %v4497_v33 }
 0xc30   :  { %3591 = vmatpush3.bf16.msra.mxu1 %v4497_v33 }
 0xc31   :  { %3616 = vmatprep.subr.mxu1 %v3906_v14 }
 0xc33   :  { %3553 = vmatmul.mubr.msk.bf16.gmra.mxu1 %vm336_vm3, %v3849_v1 }
 0xc34   :  { %3556 = vmatprep.mubr.msk.bf16.mxu1 %vm336_vm3, %v3850_v30 }
 0xc3b   :  { %3557 = vmatmul.mubr.msk.bf16.gmra.mxu1 %vm336_vm3, %v3851_v2 }
 0xc3c   :  { %3560 = vmatprep.mubr.msk.bf16.mxu1 %vm336_vm3, %v3852_v7 }
 0xc43   :  { %3561 = vmatmul.mubr.msk.bf16.gmra.mxu1 %vm336_vm3, %v3853_v27 }
 0xc44   :  { %3592 = vmatprep.mubr.msk.bf16.mxu1 %vm522_vm4, %v1961_v42 }
 0xc4b   :  { %3593 = vmatmul.mubr.msk.bf16.vlgmr.msra.gmra.mxu1 %vm522_vm4, %v1962_v19  ;;  %v3798_v19 = vpop.permute.xlu1 %3797 }
 0xc4c   :  { %3596 = vmatprep.mubr.msk.bf16.mxu1 %vm522_vm4, %v1963_v54  ;;  %v3800_v58 = vunpack.i.h.bf16 %v3798_v19  ;;  %v3799_v42 = vunpack.i.l.bf16 %v3798_v19 }
 0xc4f   :  { %v3808_v1 = vpop.permute.xlu1 %3807 }
 0xc50   :  { %v3810_v7 = vunpack.i.h.bf16 %v3808_v1 }
 0xc53   :  { %3597 = vmatmul.mubr.msk.bf16.gmra.mxu1 %vm522_vm4, %v1964_v26 }
 0xc54   :  { %3632 = vmatprep.mubr.msk.f32.mxu1 %vm3908_vm5, %v3906_v14 }
 0xceb   :  { %v4537_v28 = vpop.f32.mrf.mxu1 }
 0xcec   :  { %v2232_v27 = vsel %vm522_vm4, %v4537_v28, %v3804_v63 }
 0xced   :  { %v4539_v31 = vpop.f32.mrf.mxu1 }
 0xcef   :  { %v4541_v10 = vpop.f32.mrf.mxu1 }
 0xcf0   :  { %v2233_v2 = vsel %vm522_vm4, %v4541_v10, %v3805_v45 }
 0xcf1   :  { %v4543_v6 = vpop.f32.mrf.mxu1 }
 0xcf3   :  { %v3554_v5 = vpop.f32.mrf.mxu1 }
 0xcf4   :  { %v2236_v4 = vsel %vm522_vm4, %v3554_v5, %v3794_v49  ;;  %v2247_v5 = vpack.c.bf16 %v2233_v2, %v2232_v27 }
 0xcf5   :  { %v2119_v41 = vpop.f32.mrf.mxu1 }
 0xcf6   :  { %v2234_v60 = vsel %vm522_vm4, %v2119_v41, %v3799_v42 }
 0xcf7   :  { %v3555_v61 = vpop.f32.mrf.mxu1 }
 0xcf8   :  { %v2237_v43 = vsel %vm522_vm4, %v3555_v61, %v3795_v21  ;;  %v3809_v61 = vunpack.i.l.bf16 %v3808_v1 }
 0xcf9   :  { %v2122_v11 = vpop.f32.mrf.mxu1  ;;  %v2249_v34 = vpack.c.bf16 %v2237_v43, %v2236_v4 }
 0xcfa   :  { %v2235_v55 = vsel %vm522_vm4, %v2122_v11, %v3800_v58  ;;  %v2231_v11 = vsel %vm522_vm4, %v4543_v6, %v3810_v7  ;;  %v2230_v41 = vsel %vm522_vm4, %v4539_v31, %v3809_v61  ;;  %v3854_v6 = vld [vmem:[%s4690_s3 + $0x8] sm:$0xff]   ;;  %v3855_v31 = vld [vmem:[%s4690_s3 + $0x10] sm:$0xff]  }
 0xcfb   :  { %v3558_v46 = vpop.f32.mrf.mxu1  ;;  %v2248_v30 = vpack.c.bf16 %v2235_v55, %v2234_v60 }
 0xcfc   :  { %v2240_v20 = vsel %vm522_vm4, %v3558_v46, %v3784_v48  ;;  %v1938_v46 = vld [vmem:[#allocation2 + $0xe0] sm:$0xff] }
 0xcfd   :  { %v2135_v40 = vpop.f32.mrf.mxu1 }
 0xcfe   :  { %v2238_v54 = vsel %vm522_vm4, %v2135_v40, %v3789_v53  ;;  %v1939_v40 = vld [vmem:[#allocation2 + $0xe8] sm:$0xff] }
 0xcff   :  { %v3559_v35 = vpop.f32.mrf.mxu1  ;;  %v1943_v10 = vpack.c.bf16 %v1939_v40, %v1938_v46 }
 0xd00   :  { %v2241_v9 = vsel %vm522_vm4, %v3559_v35, %v3785_v47  ;;  %v2246_v35 = vpack.c.bf16 %v2231_v11, %v2230_v41 }
 0xd01   :  { %v2138_v13 = vpop.f32.mrf.mxu1  ;;  %v2251_v25 = vpack.c.bf16 %v2241_v9, %v2240_v20 }
 0xd02   :  { %v2239_v26 = vsel %vm522_vm4, %v2138_v13, %v3790_v51  ;;  %v1936_v13 = vld [vmem:[#allocation2 + $0xd0] sm:$0xff] }
 0xd03   :  { %v3562_v0 = vpop.f32.mrf.mxu1  ;;  %v2250_v57 = vpack.c.bf16 %v2239_v26, %v2238_v54  ;;  %v1942_v28 = vpack.c.bf16 %v1937_v16, %v1936_v13  ;;  %v3046_v26 = vld [vmem:[#allocation2 + $0x1c0] ss:$0 sm:$0xff] }
 0xd04   :  { %v2244_v38 = vsel %vm522_vm4, %v3562_v0, %v3774_v29  ;;  %v3856_v0 = vld [vmem:[%s4690_s3 + $0x18] sm:$0xff]  }
 0xd05   :  { %v2151_v18 = vpop.f32.mrf.mxu1 }
 0xd06   :  { %v2242_v15 = vsel %vm522_vm4, %v2151_v18, %v3779_v62 }
 0xd07   :  { %v3563_v52 = vpop.f32.mrf.mxu1 }
 0xd08   :  { %v2245_v39 = vsel %vm522_vm4, %v3563_v52, %v3775_v3 }
 0xd09   :  { %v2253_v36 = vpack.c.bf16 %v2245_v39, %v2244_v38  ;;  %v2154_v37 = vpop.f32.mrf.mxu1 }
 0xd0a   :  { %v2243_v50 = vsel %vm522_vm4, %v2154_v37, %v3780_v59 }
 0xd0b   :  { %v2252_v8 = vpack.c.bf16 %v2243_v50, %v2242_v15  ;;  %3564 = vmatprep.subr.bf16.mxu0 %v2253_v36 }
 0xd0c   :  { %3565 = vmatpush3.bf16.msra.mxu0 %v2253_v36 }
 0xd0d   :  { %3566 = vmatprep.subr.bf16.mxu0 %v2252_v8 }
 0xd10   :  { %3567 = vmatpush3.bf16.msra.mxu0 %v2252_v8 }
 0xd11   :  { %3568 = vmatprep.subr.bf16.mxu0 %v2251_v25 }
 0xd14   :  { %3569 = vmatpush3.bf16.msra.mxu0 %v2251_v25 }
 0xd15   :  { %3570 = vmatprep.subr.bf16.mxu0 %v2250_v57 }
 0xd18   :  { %3571 = vmatpush3.bf16.msra.mxu0 %v2250_v57 }
 0xd19   :  { %3572 = vmatprep.subr.bf16.mxu0 %v2249_v34 }
 0xd1c   :  { %3573 = vmatpush3.bf16.msra.mxu0 %v2249_v34 }
 0xd1d   :  { %3574 = vmatprep.subr.bf16.mxu0 %v2248_v30 }
 0xd20   :  { %3575 = vmatpush3.bf16.msra.mxu0 %v2248_v30 }
 0xd21   :  { %3576 = vmatprep.subr.bf16.mxu0 %v2247_v5 }
 0xd24   :  { %3577 = vmatpush3.bf16.msra.mxu0 %v2247_v5 }
 0xd25   :  { %3578 = vmatprep.subr.bf16.mxu0 %v2246_v35 }
 0xd28   :  { %3579 = vmatpush3.bf16.msra.mxu0 %v2246_v35 }
 0xd29   :  { %3600 = vmatprep.subr.bf16.mxu0 %v1943_v10 }
 0xd2b   :  { %3581 = vmatmul.mubr.bf16.vlgmr.msra.gmra.mxu0 %v3854_v6 }
 0xd2c   :  { %3584 = vmatprep.mubr.bf16.mxu0 %v3855_v31  ;;  %3601 = vmatpush3.bf16.msra.mxu0 %v1943_v10 }
 0xd2d   :  { %3602 = vmatprep.subr.bf16.mxu0 %v1942_v28 }
 0xd30   :  { %3603 = vmatpush3.bf16.msra.mxu0 %v1942_v28 }
 0xd31   :  { %3604 = vmatprep.subr.bf16.mxu0 %v4494_v32 }
 0xd33   :  { %3585 = vmatmul.mubr.bf16.gmra.mxu0 %v3856_v0 }
 0xd34   :  { %3605 = vmatpush3.bf16.msra.mxu0 %v4494_v32 }
 0xd35   :  { %3606 = vmatprep.subr.bf16.mxu0 %v4497_v33 }
 0xd38   :  { %3607 = vmatpush3.bf16.msra.mxu0 %v4497_v33  ;;  %v3594_v33 = vpop.f32.mrf.mxu1 }
 0xd3a   :  { %v2369_v37 = vpop.f32.mrf.mxu1 }
 0xd3c   :  { %v3595_v47 = vpop.f32.mrf.mxu1 }
 0xd3e   :  { %v2372_v48 = vpop.f32.mrf.mxu1 }
 0xd40   :  { %v3598_v50 = vpop.f32.mrf.mxu1 }
 0xd42   :  { %v2385_v17 = vpop.f32.mrf.mxu1 }
 0xd44   :  { %v3599_v53 = vpop.f32.mrf.mxu1 }
 0xd46   :  { %v2388_v4 = vpop.f32.mrf.mxu1 }
 0xdeb   :  { %v3582_v29 = vpop.f32.mrf.mxu0 }
 0xded   :  { %v2288_v18 = vpop.f32.mrf.mxu0 }
 0xdef   :  { %v3583_v3 = vpop.f32.mrf.mxu0 }
 0xdf0   :  { %v2320_v59 = vpack.c.bf16 %v3583_v3, %v3582_v29 }
 0xdf1   :  { %v2291_v12 = vpop.f32.mrf.mxu0 }
 0xdf2   :  { %v2319_v52 = vpack.c.bf16 %v2291_v12, %v2288_v18 }
 0xdf3   :  { %v3586_v62 = vpop.f32.mrf.mxu0 }
 0xdf4   :  { %3608 = vmatprep.mubr.msk.bf16.mxu0 %vm336_vm3, %v2319_v52 }
 0xdf5   :  { %v2304_v38 = vpop.f32.mrf.mxu0  ;;  %3609 = vmatmul.mubr.msk.bf16.vlgmr.msra.gmra.mxu0 %vm336_vm3, %v2320_v59 }
 0xdf7   :  { %v3587_v39 = vpop.f32.mrf.mxu0 }
 0xdf8   :  { %v2322_v32 = vpack.c.bf16 %v3587_v39, %v3586_v62 }
 0xdf9   :  { %v2307_v23 = vpop.f32.mrf.mxu0 }
 0xdfa   :  { %v2321_v36 = vpack.c.bf16 %v2307_v23, %v2304_v38 }
 0xdfc   :  { %3612 = vmatprep.mubr.msk.bf16.mxu0 %vm336_vm3, %v2321_v36 }
 0xdfd   :  { %3613 = vmatmul.mubr.msk.bf16.gmra.mxu0 %vm336_vm3, %v2322_v32 }
 0xeb5   :  { %v3610_v15 = vpop.f32.mrf.mxu0 }
 0xeb6   :  { %v2455_v54 = vadd.f32 %v3610_v15, %v3594_v33  ;;  %v1950_v33 = vld [vmem:[#allocation2 + $0x1a0] sm:$0xff]  ;;  %v1949_v15 = vld [vmem:[#allocation2 + $0x198] sm:$0xff] }
 0xeb7   :  { %v2446_v8 = vpop.f32.mrf.mxu0 }
 0xeb8   :  { %v4591_v55 = vadd.f32 %v3046_v26, %v2455_v54  ;;  %v2447_v45 = vadd.f32 %v2446_v8, %v2369_v37  ;;  %v1951_v37 = vld [vmem:[#allocation2 + $0x1a8] sm:$0xff] }
 0xeb9   :  { %v3611_v9 = vpop.f32.mrf.mxu0 }
 0xeba   :  { %v2458_v63 = vadd.f32 %v3611_v9, %v3595_v47  ;;  %v4601_v2 = vadd.f32 %v3046_v26, %v2447_v45  ;;  %v2491_v61 = vmul.f32 %v4591_v55, %v4591_v55  ;;  %v1948_v47 = vld [vmem:[#allocation2 + $0x190] sm:$0xff] }
 0xebb   :  { %v2449_v51 = vpop.f32.mrf.mxu0 }
 0xebc   :  { %v4603_v7 = vadd.f32 %v3046_v26, %v2458_v63  ;;  %v2450_v27 = vadd.f32 %v2449_v51, %v2372_v48  ;;  %v2489_v46 = vmul.f32 %v4601_v2, %v4601_v2  ;;  %v1955_v48 = vpack.c.bf16 %v1951_v37, %v1950_v33  ;;  %v1947_v51 = vld [vmem:[#allocation2 + $0x188] sm:$0xff] }
 0xebd   :  { %v3614_v20 = vpop.f32.mrf.mxu0 }
 0xebe   :  { %v2471_v25 = vadd.f32 %v3614_v20, %v3598_v50  ;;  %v4611_v11 = vadd.f32 %v3046_v26, %v2450_v27  ;;  %v2492_v41 = vmul.f32 %v4603_v7, %v4603_v7  ;;  %v1954_v50 = vpack.c.bf16 %v1949_v15, %v1948_v47  ;;  %3635 = vmatprep.subr.bf16.mxu0 %v1955_v48  ;;  %v2838_v47 = vld [vmem:[#allocation2 + $0x1e0] sm:$0xff]  ;;  %v2836_v15 = vld [vmem:[#allocation2 + $0x1d0] sm:$0xff] }
 0xebf   :  { %v2462_v22 = vpop.f32.mrf.mxu0  ;;  %3636 = vmatpush3.bf16.msra.mxu0 %v1955_v48  ;;  %v2837_v48 = vld [vmem:[#allocation2 + $0x1d8] sm:$0xff] }
 0xec0   :  { %v4582_v21 = vadd.f32 %v3046_v26, %v2471_v25  ;;  %v2463_v49 = vadd.f32 %v2462_v22, %v2385_v17  ;;  %v2490_v40 = vmul.f32 %v4611_v11, %v4611_v11  ;;  %3637 = vmatprep.subr.bf16.mxu0 %v1954_v50  ;;  %v1946_v17 = vld [vmem:[#allocation2 + $0x180] sm:$0xff]  ;;  %v1944_v25 = vld [vmem:[#allocation2 + $0x170] sm:$0xff] }
 0xec1   :  { %v3615_v57 = vpop.f32.mrf.mxu0  ;;  %v1953_v20 = vpack.c.bf16 %v1947_v51, %v1946_v17 }
 0xec2   :  { %v4584_v43 = vadd.f32 %v3046_v26, %v2463_v49  ;;  %v2474_v19 = vadd.f32 %v3615_v57, %v3599_v53  ;;  %v2495_v58 = vmul.f32 %v4582_v21, %v4582_v21  ;;  %v1945_v53 = vld [vmem:[#allocation2 + $0x178] sm:$0xff] }
 0xec3   :  { %v2465_v44 = vpop.f32.mrf.mxu0  ;;  %3638 = vmatpush3.bf16.msra.mxu0 %v1954_v50  ;;  %v2835_v50 = vld [vmem:[#allocation2 + $0x1c8] sm:$0xff] }
 0xec4   :  { %v4588_v34 = vadd.f32 %v3046_v26, %v2474_v19  ;;  %v2466_v42 = vadd.f32 %v2465_v44, %v2388_v4  ;;  %2517 = vrot.lane.b32.xlu1 %v2495_v58, %s3907_s0  ;;  %v2493_v30 = vmul.f32 %v4584_v43, %v4584_v43  ;;  %3639 = vmatprep.subr.bf16.mxu0 %v1953_v20  ;;  %v3048_v44 = vld [vmem:[#allocation2 + $0x1c1] ss:$0 sm:$0xff] }
 0xec6   :  { %v4593_v60 = vadd.f32 %v3046_v26, %v2466_v42  ;;  %v2496_v1 = vmul.f32 %v4588_v34, %v4588_v34  ;;  %v1952_v26 = vpack.c.bf16 %v1945_v53, %v1944_v25  ;;  %v3050_v25 = vld [vmem:[#allocation2 + $0x1c4] ss:$0 sm:$0xff] }
 0xec7   :  { %3640 = vmatpush3.bf16.msra.mxu0 %v1953_v20 }
 0xec8   :  { %2519 = vrot.lane.b32.xlu0 %v2496_v1, %s3907_s0  ;;  %2513 = vrot.lane.b32.xlu1 %v2493_v30, %s3907_s0  ;;  %v2494_v5 = vmul.f32 %v4593_v60, %v4593_v60 }
 0xec9   :  { %3641 = vmatprep.subr.bf16.mxu0 %v1952_v26 }
 0xecb   :  { %3642 = vmatpush3.bf16.msra.mxu0 %v1952_v26 }
 0xecc   :  { %2515 = vrot.lane.b32.xlu0 %v2494_v5, %s3907_s0  ;;  %2509 = vrot.lane.b32.xlu1 %v2491_v61, %s3907_s0  ;;  %v3049_v61 = vld [vmem:[#allocation2 + $0x1c2] ss:$0 sm:$0xff] }
 0xecd   :  { %3670 = vmatprep.subr.mxu0 %v3906_v14 }
 0xed0   :  { %2511 = vrot.lane.b32.xlu0 %v2492_v41, %s3907_s0  ;;  %2505 = vrot.lane.b32.xlu1 %v2489_v46, %s3907_s0 }
 0xed4   :  { %2507 = vrot.lane.b32.xlu0 %v2490_v40, %s3907_s0 }
 0xf36   :  { %v2518_v35 = vpop.permute.xlu1 %2517 }
 0xf37   :  { %v2535_v28 = vsel %vm336_vm3, %v4582_v21, %v2518_v35 }
 0xf3a   :  { %v2520_v10 = vpop.permute.xlu0 %2519  ;;  %v2514_v13 = vpop.permute.xlu1 %2513 }
 0xf3b   :  { %v2536_v16 = vsel %vm336_vm3, %v4588_v34, %v2520_v10  ;;  %v2533_v29 = vsel %vm336_vm3, %v4584_v43, %v2514_v13 }
 0xf3c   :  { %3617 = vmatpush3.msra.mxu1 %v2536_v16 }
 0xf3d   :  { %3618 = vmatprep.subr.mxu1 %v3906_v14 }
 0xf3e   :  { %3619 = vmatpush3.msra.mxu1 %v2535_v28  ;;  %v2516_v6 = vpop.permute.xlu0 %2515  ;;  %v2510_v0 = vpop.permute.xlu1 %2509 }
 0xf3f   :  { %v2534_v31 = vsel %vm336_vm3, %v4593_v60, %v2516_v6  ;;  %3620 = vmatprep.subr.mxu1 %v3906_v14  ;;  %v2531_v12 = vsel %vm336_vm3, %v4591_v55, %v2510_v0 }
 0xf40   :  { %3621 = vmatpush3.msra.mxu1 %v2534_v31 }
 0xf41   :  { %3622 = vmatprep.subr.mxu1 %v3906_v14 }
 0xf42   :  { %v2512_v18 = vpop.permute.xlu0 %2511  ;;  %3623 = vmatpush3.msra.mxu1 %v2533_v29  ;;  %v2506_v52 = vpop.permute.xlu1 %2505 }
 0xf43   :  { %v2532_v3 = vsel %vm336_vm3, %v4603_v7, %v2512_v18  ;;  %3624 = vmatprep.subr.mxu1 %v3906_v14  ;;  %v2529_v38 = vsel %vm336_vm3, %v4601_v2, %v2506_v52 }
 0xf44   :  { %3625 = vmatpush3.msra.mxu1 %v2532_v3 }
 0xf45   :  { %3626 = vmatprep.subr.mxu1 %v3906_v14 }
 0xf46   :  { %v2508_v59 = vpop.permute.xlu0 %2507  ;;  %3627 = vmatpush3.msra.mxu1 %v2531_v12 }
 0xf47   :  { %v2530_v62 = vsel %vm336_vm3, %v4611_v11, %v2508_v59  ;;  %3628 = vmatprep.subr.mxu1 %v3906_v14 }
 0xf48   :  { %3629 = vmatpush3.msra.mxu1 %v2530_v62 }
 0xf49   :  { %3630 = vmatprep.subr.mxu1 %v3906_v14 }
 0xf4a   :  { %3631 = vmatpush3.msra.mxu1 %v2529_v38 }
 0xf4b   :  { %3633 = vmatmul.mubr.msk.f32.vlgmr.msra.gmra.mxu1 %vm336_vm3, %v3909_v56  ;;  %3651 = vmatprep.subr.mxu1 %v3906_v14 }
 0xf4c   :  { %3667 = vmatprep.mubr.msk.f32.mxu1 %vm3908_vm5, %v3906_v14 }
0x100b   :  { %v2603_v39 = vpop.f32.mrf.mxu1 }
0x100c   :  { %v2607_v23 = vmul.f32 0.015625, %v2603_v39 }
0x100d   :  { %v3634_v36 = vpop.f32.mrf.mxu1 }
0x100e   :  { %v2608_v32 = vmul.f32 %v2607_v23, %v2607_v23  ;;  %v2617_v54 = vrot.slane %v2607_v23, %v4254_v24 }
0x1010   :  { %2610 = vrot.lane.b32.xlu0 %v2608_v32, %s3907_s0  ;;  %v2620_v57 = vsub.f32 %v4591_v55, %v2617_v54  ;;  %v2621_v19 = vsub.f32 %v4603_v7, %v2617_v54  ;;  %v2618_v58 = vsub.f32 %v4601_v2, %v2617_v54  ;;  %v2619_v4 = vsub.f32 %v4611_v11, %v2617_v54 }
0x1011   :  { %v2622_v45 = vsub.f32 %v4584_v43, %v2617_v54  ;;  %v2623_v63 = vsub.f32 %v4593_v60, %v2617_v54  ;;  %v2624_v1 = vsub.f32 %v4582_v21, %v2617_v54  ;;  %v2625_v30 = vsub.f32 %v4588_v34, %v2617_v54 }
0x1082   :  { %v2611_v56 = vpop.permute.xlu0 %2610 }
0x1083   :  { %v2613_v8 = vsub.f32 %v2607_v23, %v2611_v56 }
0x1085   :  { %v2626_v9 = vadd.f32 1e-05, %v2613_v8 }
0x1087   :  { %3835 = vrsqrt.f32 %v2626_v9 }
0x1094   :  { %v3836_v22 = vpop.eup %3835 }
0x1095   :  { %v2631_v49 = vrot.slane %v3836_v22, %v4254_v24 }
0x1097   :  { %2633 = vrot.lane.b32.xlu1 %v2631_v49, %s3907_s0 }
0x1109   :  { %v2634_v42 = vpop.permute.xlu1 %2633 }
0x110a   :  { %v2638_v27 = vmul.f32 %v2634_v42, %v2620_v57  ;;  %v2639_v24 = vmul.f32 %v2634_v42, %v2621_v19  ;;  %v2636_v5 = vmul.f32 %v2634_v42, %v2618_v58  ;;  %v2637_v55 = vmul.f32 %v2634_v42, %v2619_v4 }
0x110b   :  { %v2640_v7 = vmul.f32 %v2634_v42, %v2622_v45  ;;  %v2641_v41 = vmul.f32 %v2634_v42, %v2623_v63  ;;  %v2642_v2 = vmul.f32 %v2634_v42, %v2624_v1  ;;  %v2643_v46 = vmul.f32 %v2634_v42, %v2625_v30  ;;  %v2761_v42 = vld [vmem:[%s4691_s4] sm:$0xff]  ;;  %v3056_v1 = vld [vmem:[#allocation2 + $0x1e8] ss:$0 sm:$0xff] }
0x110c   :  { %v2650_v11 = vmul.f32 %v3048_v44, %v2638_v27  ;;  %v2651_v40 = vmul.f32 %v3048_v44, %v2639_v24  ;;  %v2648_v35 = vmul.f32 %v3048_v44, %v2636_v5  ;;  %v2649_v10 = vmul.f32 %v3048_v44, %v2637_v55 }
0x110d   :  { %v2652_v43 = vmul.f32 %v3048_v44, %v2640_v7  ;;  %v2653_v13 = vmul.f32 %v3048_v44, %v2641_v41  ;;  %v2654_v31 = vmul.f32 %v3048_v44, %v2642_v2  ;;  %v2655_v0 = vmul.f32 %v3048_v44, %v2643_v46 }
0x110e   :  { %v2662_v60 = vadd.f32 %v3049_v61, %v2650_v11  ;;  %v2663_v16 = vadd.f32 %v3049_v61, %v2651_v40  ;;  %v2660_v21 = vadd.f32 %v3049_v61, %v2648_v35  ;;  %v2661_v28 = vadd.f32 %v3049_v61, %v2649_v10 }
0x110f   :  { %v2664_v34 = vadd.f32 %v3049_v61, %v2652_v43  ;;  %v2665_v6 = vadd.f32 %v3049_v61, %v2653_v13  ;;  %v2666_v39 = vadd.f32 %v3049_v61, %v2654_v31  ;;  %v2667_v23 = vadd.f32 %v3049_v61, %v2655_v0 }
0x1110   :  { %v2668_v29 = vmax.f32 %v2660_v21, 0.0  ;;  %v2669_v18 = vmax.f32 %v2661_v28, 0.0  ;;  %v2670_v3 = vmax.f32 %v2662_v60, 0.0  ;;  %v2671_v12 = vmax.f32 %v2663_v16, 0.0 }
0x1111   :  { %v2672_v52 = vmax.f32 %v2664_v34, 0.0  ;;  %v2673_v59 = vmax.f32 %v2665_v6, 0.0  ;;  %v2674_v32 = vmax.f32 %v2666_v39, 0.0  ;;  %v2675_v33 = vmax.f32 %v2667_v23, 0.0 }
0x1112   :  { %v2676_v62 = vpack.c.bf16 %v2669_v18, %v2668_v29  ;;  %v2677_v38 = vpack.c.bf16 %v2671_v12, %v2670_v3 }
0x1113   :  { %v2678_v36 = vpack.c.bf16 %v2673_v59, %v2672_v52  ;;  %v2679_v37 = vpack.c.bf16 %v2675_v33, %v2674_v32 }
0x1114   :  { %3643 = vmatprep.mubr.msk.bf16.mxu0 %vm336_vm3, %v2676_v62 }
0x1115   :  { %3644 = vmatmul.mubr.msk.bf16.vlgmr.msra.gmra.mxu0 %vm336_vm3, %v2677_v38 }
0x1116   :  { %3647 = vmatprep.mubr.msk.bf16.mxu0 %vm336_vm3, %v2678_v36  ;;  %3671 = vmatpush3.msra.mxu0 %v2838_v47 }
0x1117   :  { %3672 = vmatprep.subr.mxu0 %v3906_v14 }
0x1118   :  { %3673 = vmatpush3.msra.mxu0 %v2837_v48 }
0x1119   :  { %3674 = vmatprep.subr.mxu0 %v3906_v14 }
0x111a   :  { %3675 = vmatpush3.msra.mxu0 %v2836_v15 }
0x111b   :  { %3676 = vmatprep.subr.mxu0 %v3906_v14 }
0x111c   :  { %3677 = vmatpush3.msra.mxu0 %v2835_v50 }
0x111d   :  { %3648 = vmatmul.mubr.msk.bf16.gmra.mxu0 %vm336_vm3, %v2679_v37 }
0x111e   :  { %3678 = vmatprep.mubr.msk.f32.mxu0 %vm3908_vm5, %v3906_v14 }
0x11d5   :  { %v3645_v56 = vpop.f32.mrf.mxu0 }
0x11d6   :  { %v2739_v58 = vadd.f32 %v3645_v56, %v3050_v25 }
0x11d7   :  { %v2730_v8 = vpop.f32.mrf.mxu0 }
0x11d8   :  { %v2731_v44 = vadd.f32 %v3050_v25, %v2730_v8 }
0x11d9   :  { %v3646_v9 = vpop.f32.mrf.mxu0 }
0x11da   :  { %v2742_v19 = vadd.f32 %v3646_v9, %v3050_v25 }
0x11db   :  { %v2733_v17 = vpop.f32.mrf.mxu0 }
0x11dc   :  { %v2734_v4 = vadd.f32 %v3050_v25, %v2733_v17 }
0x11dd   :  { %v3649_v51 = vpop.f32.mrf.mxu0 }
0x11de   :  { %v2755_v49 = vadd.f32 %v3649_v51, %v3050_v25 }
0x11df   :  { %v2746_v20 = vpop.f32.mrf.mxu0 }
0x11e0   :  { %v2747_v57 = vadd.f32 %v3050_v25, %v2746_v20 }
0x11e1   :  { %v3650_v53 = vpop.f32.mrf.mxu0 }
0x11e2   :  { %v2758_v26 = vadd.f32 %v3650_v53, %v3050_v25 }
0x11e3   :  { %v2749_v22 = vpop.f32.mrf.mxu0 }
0x11e4   :  { %3652 = vmatpush3.msra.mxu1 %v2758_v26  ;;  %v2750_v54 = vadd.f32 %v3050_v25, %v2749_v22 }
0x11e5   :  { %3653 = vmatprep.subr.mxu1 %v3906_v14 }
0x11e6   :  { %3654 = vmatpush3.msra.mxu1 %v2755_v49 }
0x11e7   :  { %3655 = vmatprep.subr.mxu1 %v3906_v14 }
0x11e8   :  { %3656 = vmatpush3.msra.mxu1 %v2750_v54 }
0x11e9   :  { %3657 = vmatprep.subr.mxu1 %v3906_v14 }
0x11ea   :  { %3658 = vmatpush3.msra.mxu1 %v2747_v57 }
0x11eb   :  { %3659 = vmatprep.subr.mxu1 %v3906_v14 }
0x11ec   :  { %3660 = vmatpush3.msra.mxu1 %v2742_v19 }
0x11ed   :  { %3661 = vmatprep.subr.mxu1 %v3906_v14 }
0x11ee   :  { %3662 = vmatpush3.msra.mxu1 %v2739_v58 }
0x11ef   :  { %3663 = vmatprep.subr.mxu1 %v3906_v14 }
0x11f0   :  { %3664 = vmatpush3.msra.mxu1 %v2734_v4 }
0x11f1   :  { %3665 = vmatprep.subr.mxu1 %v3906_v14 }
0x11f2   :  { %3666 = vmatpush3.msra.mxu1 %v2731_v44 }
0x11f3   :  { %3668 = vmatmul.mubr.msk.f32.vlgmr.msra.gmra.mxu1 %vm336_vm3, %v2761_v42 }
0x12b3   :  { %v2831_v45 = vpop.f32.mrf.mxu1 }
0x12b4   :  { %3679 = vmatmul.mubr.msk.f32.vlgmr.msra.gmra.mxu0 %vm522_vm4, %v2831_v45 }
0x12b5   :  { %v3669_v63 = vpop.f32.mrf.mxu1 }
0x1374   :  { %v2913_v30 = vpop.f32.mrf.mxu0 }
0x1375   :  { %v2914_v27 = vadd.f32 %v3056_v1, %v2913_v30 }
0x1376   :  { %v3680_v24 = vpop.f32.mrf.mxu0 }
0x1377   :  { %2917 = vst [vmem:[#allocation5] sm:$0xff] %v2914_v27 }
0x1378   :  { %3888 = shalt.err (!%p3885_p9)
}
0x1379   :  { %2927 = dma.vmem_to_hbm [thread:$0]  %s2925_s23, 128, %s4693_s6, [#allocation4]  }
0x137a   :  { %3899 = dma.done.wait [#allocation4], 128  }
0x137b   :  { %3900 = vsyncadd [#allocation4], 4294967168 }
0x137c   :  { %2931 = vsyncpa [#allocation3], 1 }
0x137d   :  { %2932 = vsyncpa [#allocation4], 1 }

</bundles_post_ra>
